<compile_context>
chip_gen: v7x
topology: tpu7x:2x2x1
jax: 0.10.0
libtpu: 0.0.40
codegen_flags: <defaults>
</compile_context>

<pallas_src>
import functools

import jax
import jax.numpy as jnp
from jax.experimental import pallas as pl
from jax.experimental.pallas import tpu as pltpu


def _round_up(x, m):
    return ((x + m - 1) // m) * m


def _pick_tile(dim, pref, align):
    """Largest multiple of `align` <= min(pref, dim) that divides `dim`.

    `dim` must itself be a multiple of `align` (guaranteed by padding)."""
    t = max(align, (min(pref, dim) // align) * align)
    while dim % t:
        t -= align
    return t


# ----------------------------------------------------------------------------
# Tiled Linear kernel: y = x @ W + b, bf16 MXU operands, f32 VMEM accumulator.
# ----------------------------------------------------------------------------
def _linear_kernel(x_ref, w_ref, b_ref, o_ref, acc_ref):
    k = pl.program_id(2)

    @pl.when(k == 0)
    def _():
        # Fold the bias into the accumulator init (broadcast (1, tn) -> tile),
        # so the finalize branch is a pure cast+store.
        acc_ref[...] = jnp.zeros_like(acc_ref) + b_ref[...].astype(jnp.float32)

    # bf16 x bf16 MXU matmul with f32 accumulation.
    acc_ref[...] += jnp.dot(
        x_ref[...].astype(jnp.bfloat16),
        w_ref[...],
        preferred_element_type=jnp.float32,
    )

    @pl.when(k == pl.num_programs(2) - 1)
    def _():
        o_ref[...] = acc_ref[...].astype(o_ref.dtype)


@functools.partial(jax.jit, static_argnames=("nout", "tm", "tn", "tk"))
def linear_forward(x, w, b2d, *, nout, tm=512, tn=512, tk=1024):
    """y = x @ W + b with a tiled Pallas matmul.

    `w` is (kp, np_) pre-padded bf16; `b2d` is (1, np_) pre-padded f32."""
    seq, kin = x.shape
    kp, np_ = w.shape

    # M-axis sublane alignment: 16 (bf16 operand packing in the MXU path).
    sp = _round_up(seq, 16)
    tm_e = _pick_tile(sp, tm, 16)
    tn_e = _pick_tile(np_, tn, 128)
    tk_e = _pick_tile(kp, tk, 128)

    # Activation padding is a no-op for aligned shapes (the common case);
    # the weight/bias were padded once at construction time, never here.
    if (sp, kp) != (seq, kin):
        x = jnp.pad(x, ((0, sp - seq), (0, kp - kin)))

    grid = (sp // tm_e, np_ // tn_e, kp // tk_e)  # reduction axis K last

    flops = 2 * sp * np_ * kp
    bytes_accessed = (
        x.size * x.dtype.itemsize
        + w.size * w.dtype.itemsize
        + b2d.size * b2d.dtype.itemsize
        + sp * np_ * x.dtype.itemsize
    )

    out = pl.pallas_call(
        _linear_kernel,
        out_shape=jax.ShapeDtypeStruct((sp, np_), x.dtype),
        grid_spec=pltpu.PrefetchScalarGridSpec(
            num_scalar_prefetch=0,
            grid=grid,
            in_specs=[
                pl.BlockSpec((tm_e, tk_e), lambda i, j, k: (i, k)),
                pl.BlockSpec((tk_e, tn_e), lambda i, j, k: (k, j)),
                pl.BlockSpec((1, tn_e), lambda i, j, k: (0, j)),
            ],
            # output index_map ignores k -> tile stays VMEM-resident across K
            out_specs=pl.BlockSpec((tm_e, tn_e), lambda i, j, k: (i, j)),
            scratch_shapes=[pltpu.VMEM((tm_e, tn_e), jnp.float32)],
        ),
        compiler_params=pltpu.CompilerParams(
            dimension_semantics=("parallel", "parallel", "arbitrary"),
            vmem_limit_bytes=48 * 1024 * 1024,  # stays under v7x 64 MiB phys
        ),
        cost_estimate=pl.CostEstimate(
            flops=flops, transcendentals=0, bytes_accessed=bytes_accessed
        ),
    )(x, w, b2d)

    # Slice only when padding actually happened (no extra HBM pass otherwise).
    if (sp, np_) != (seq, nout):
        out = out[:seq, :nout]
    return out


# ----------------------------------------------------------------------------
# DeviceMover equivalent
# ----------------------------------------------------------------------------
class DeviceMoverPallas:
    """Moves tensor args to the target device, then runs the wrapped module.

    `.to(device)` == jax.device_put (pure data placement, no kernel needed);
    the wrapped module's forward is the single fused Pallas matmul above.
    Static parameters are padded / cast to bf16 exactly once here.
    """

    def __init__(self, module_params, device, *, tm=512, tn=512, tk=1024):
        self.device = device
        self.tm, self.tn, self.tk = tm, tn, tk

        w = jnp.asarray(module_params["w"])   # (in_features, out_features)
        b = jnp.asarray(module_params["b"])   # (out_features,)
        kin, nout = w.shape
        self.nout = nout

        # One-time padding of static parameters (never re-padded per call),
        # and a one-time bf16 cast so the kernel streams half the weight bytes
        # and feeds the MXU its native operand dtype.
        kp = _round_up(kin, 128)
        np_ = _round_up(nout, 128)
        if (kp, np_) != (kin, nout):
            w = jnp.pad(w, ((0, kp - kin), (0, np_ - nout)))
        b2d = b.reshape(1, nout).astype(jnp.float32)
        if np_ != nout:
            b2d = jnp.pad(b2d, ((0, 0), (0, np_ - nout)))

        self.w = jax.device_put(w.astype(jnp.bfloat16), device)
        self.b = jax.device_put(b2d, device)

    def _move(self, a):
        if isinstance(a, jnp.ndarray):
            return jax.device_put(a, self.device)
        return a

    def __call__(self, *args, **kwargs):
        args = [self._move(a) for a in args]
        kwargs = {k: self._move(v) for k, v in kwargs.items()}
        # TODO(synk): the real DeviceMover wraps an arbitrary nn.Module; only a
        # representative Linear forward is kernelized here.
        (x,) = args
        return linear_forward(
            x, self.w, self.b,
            nout=self.nout, tm=self.tm, tn=self.tn, tk=self.tk,
        )


if __name__ == "__main__":
    # Small, lane-dense, MXU-friendly shapes for the wrapped Linear; clipped
    # tiles make this a single grid step (no per-step overhead on tiny work).
    seq, hidden = 256, 512
    key = jax.random.PRNGKey(0)
    kx, kw, kb = jax.random.split(key, 3)

    # deterministic synthetic parameters for the wrapped Linear module
    w = jax.random.normal(kw, (hidden, hidden), dtype=jnp.float32) * 0.02
    b = jax.random.normal(kb, (hidden,), dtype=jnp.float32) * 0.01
    x = jax.random.normal(kx, (seq, hidden), dtype=jnp.float32)

    device = jax.devices()[0]
    mover = DeviceMoverPallas({"w": w, "b": b}, device)

    out = jax.block_until_ready(mover(x))

    # f32 reference; tolerance relaxed for the bf16 MXU operand path.
    ref = x @ w + b
    assert out.shape == (seq, hidden)
    max_err = float(jnp.max(jnp.abs(out - ref)))
    assert jnp.allclose(out, ref, atol=5e-2, rtol=5e-2), max_err

    print("KERNEL_OK")
</pallas_src>

<mosaic_0001>
module attributes {stable_mosaic.version = 11 : i64} {
  func.func @_linear_kernel(%arg0: i32, %arg1: i32, %arg2: i32, %arg3: memref<256x512xf32, #tpu.memory_space<vmem>>, %arg4: memref<512x512xbf16, #tpu.memory_space<vmem>>, %arg5: memref<1x512xf32, #tpu.memory_space<vmem>>, %arg6: memref<256x512xf32, #tpu.memory_space<vmem>>, %arg7: memref<256x512xf32, #tpu.memory_space<vmem>>) attributes {dimension_semantics = [#tpu.dimension_semantics<parallel>, #tpu.dimension_semantics<parallel>, #tpu.dimension_semantics<arbitrary>], iteration_bounds = array<i64: 1, 1, 1>, scalar_prefetch = 0 : i64, scratch_operands = 1 : i64, tpu.core_type = #tpu.core_type<tc>, window_params = [{transform_indices = @transform_0, window_bounds = array<i64: 256, 512>}, {transform_indices = @transform_1, window_bounds = array<i64: 512, 512>}, {transform_indices = @transform_2, window_bounds = array<i64: 1, 512>}, {transform_indices = @transform_3, window_bounds = array<i64: 256, 512>}]} {
    %c0_i32 = arith.constant 0 : i32
    %0 = arith.cmpi eq, %arg2, %c0_i32 : i32
    %1 = arith.extui %0 : i1 to i32
    %c0_i32_0 = arith.constant 0 : i32
    %2 = arith.cmpi ne, %1, %c0_i32_0 : i32
    scf.if %2 {
      %cst_10 = arith.constant 0.000000e+00 : f32
      %13 = vector.broadcast %cst_10 : f32 to vector<256x512xf32>
      %c0_11 = arith.constant 0 : index
      %c0_12 = arith.constant 0 : index
      %14 = vector.load %arg5[%c0_11, %c0_12] : memref<1x512xf32, #tpu.memory_space<vmem>>, vector<1x512xf32>
      %15 = vector.broadcast %14 : vector<1x512xf32> to vector<256x512xf32>
      %16 = arith.addf %13, %15 : vector<256x512xf32>
      %c0_13 = arith.constant 0 : index
      %c0_14 = arith.constant 0 : index
      %17 = vector.load %arg7[%c0_13, %c0_14] : memref<256x512xf32, #tpu.memory_space<vmem>>, vector<256x512xf32>
      tpu.vector_store %arg7[%c0_13, %c0_14], %16 {strides = array<i32>} : memref<256x512xf32, #tpu.memory_space<vmem>>, vector<256x512xf32>,
    } else {
    }
    %c0 = arith.constant 0 : index
    %c0_1 = arith.constant 0 : index
    %3 = vector.load %arg7[%c0, %c0_1] : memref<256x512xf32, #tpu.memory_space<vmem>>, vector<256x512xf32>
    %c0_2 = arith.constant 0 : index
    %c0_3 = arith.constant 0 : index
    %4 = vector.load %arg3[%c0_2, %c0_3] : memref<256x512xf32, #tpu.memory_space<vmem>>, vector<256x512xf32>
    %5 = arith.truncf %4 : vector<256x512xf32> to vector<256x512xbf16>
    %c0_4 = arith.constant 0 : index
    %c0_5 = arith.constant 0 : index
    %6 = vector.load %arg4[%c0_4, %c0_5] : memref<512x512xbf16, #tpu.memory_space<vmem>>, vector<512x512xbf16>
    %cst = arith.constant dense<0.000000e+00> : vector<256x512xf32>
    %7 = tpu.matmul %5, %6, %cst {dimension_numbers = #tpu.dot_dimension_numbers<[1], [0], [0], [1], [0, 0, 1, 1], [], []>} : vector<256x512xbf16>, vector<512x512xbf16>, vector<256x512xf32> -> vector<256x512xf32>
    %8 = arith.addf %3, %7 : vector<256x512xf32>
    %c0_6 = arith.constant 0 : index
    %c0_7 = arith.constant 0 : index
    %9 = vector.load %arg7[%c0_6, %c0_7] : memref<256x512xf32, #tpu.memory_space<vmem>>, vector<256x512xf32>
    tpu.vector_store %arg7[%c0_6, %c0_7], %8 {strides = array<i32>} : memref<256x512xf32, #tpu.memory_space<vmem>>, vector<256x512xf32>,
    %c0_i32_8 = arith.constant 0 : i32
    %10 = arith.cmpi eq, %arg2, %c0_i32_8 : i32
    %11 = arith.extui %10 : i1 to i32
    %c0_i32_9 = arith.constant 0 : i32
    %12 = arith.cmpi ne, %11, %c0_i32_9 : i32
    scf.if %12 {
      %c0_10 = arith.constant 0 : index
      %c0_11 = arith.constant 0 : index
      %13 = vector.load %arg7[%c0_10, %c0_11] : memref<256x512xf32, #tpu.memory_space<vmem>>, vector<256x512xf32>
      %c0_12 = arith.constant 0 : index
      %c0_13 = arith.constant 0 : index
      %14 = vector.load %arg6[%c0_12, %c0_13] : memref<256x512xf32, #tpu.memory_space<vmem>>, vector<256x512xf32>
      tpu.vector_store %arg6[%c0_12, %c0_13], %13 {strides = array<i32>} : memref<256x512xf32, #tpu.memory_space<vmem>>, vector<256x512xf32>,
    } else {
    }
    return
  }
  func.func @transform_0(%arg0: i32, %arg1: i32, %arg2: i32) -> (i32, i32) {
    %c0_i32 = arith.constant 0 : i32
    return %arg0, %arg2 : i32, i32
  }
  func.func @transform_1(%arg0: i32, %arg1: i32, %arg2: i32) -> (i32, i32) {
    %c0_i32 = arith.constant 0 : i32
    return %arg2, %arg1 : i32, i32
  }
  func.func @transform_2(%arg0: i32, %arg1: i32, %arg2: i32) -> (i32, i32) {
    %c0_i32 = arith.constant 0 : i32
    %c0_i32_0 = arith.constant 0 : i32
    return %c0_i32, %arg1 : i32, i32
  }
  func.func @transform_3(%arg0: i32, %arg1: i32, %arg2: i32) -> (i32, i32) {
    %c0_i32 = arith.constant 0 : i32
    return %arg0, %arg1 : i32, i32
  }
}

</mosaic_0001>

<bundles_post_ra>
// kernel: linear_forward.1
= control target key start
LH: loop header
LB: loop body
LE: loop exit
PB: predicated region body
PF: predicated region fallthrough
CT: control target
= control target key end

     0   :  { %8 = vsyncpa [#allocation4], 0  ;;  %s3329_s0 = inlined_call_operand.hbm [shape: f32[256,512], index: 0, kind: input, shape index: {}]   ;;  %s3330_s1 = inlined_call_operand.hbm [shape: bf16[512,512], index: 1, kind: input, shape index: {}]   ;;  %s3331_s2 = inlined_call_operand.vmem [shape: f32[1,512], index: 2, kind: input, shape index: {}]   ;;  %s3332_s3 = inlined_call_operand.hbm [shape: f32[256,512], index: 3, kind: output, shape index: {}]  }
   0x1   :  { %9 = vsyncpa [#allocation7], 0 }
   0x2   :  { %10 = vsyncpa [#allocation5], 0  ;;  %s3121_s12 = smov [#allocation3]   ;;  %s3049_s16 = scalar_lea.hbm %s3329_s0, 16384 }
   0x3   :  { %s16_s13 = sshll.u32 %s3121_s12, 4  ;;  %p3050_p0 = scmp.ne.s32.totalorder %s3329_s0, %s3049_s16  ;;  %s17_s13 = int_to_ptr.vmem [resolvable:$true] %s16_s13 }
   0x4   :  { %p3053_p1 = scmp.lt.u32.totalorder %s3049_s16, %s3329_s0 }
   0x6   :  { %p3055_p2 = pnand %p3053_p1, %p3050_p0 }
   0x8   :  { %3058 = shalt.err (!%p3055_p2)
}
   0x9   :  { %s3059_s21 = scalar_lea.vmem %s17_s13, 16384  ;;  %p3064_p4 = scmp.lt.s32.totalorder %s17_s13, %s17_s13 }
   0xa   :  { %p3060_p3 = scmp.ne.s32.totalorder %s17_s13, %s3059_s21  ;;  %p3065_p5 = scmp.lt.s32.totalorder %s3059_s21, %s3059_s21 }
   0xc   :  { %p3066_p6 = por %p3065_p5, %p3064_p4 }
   0xe   :  { %p3067_p7 = pnand %p3066_p6, %p3060_p3 }
  0x10   :  { %3070 = shalt.err (!%p3067_p7)
}
  0x11   :  { %s3122_s22 = smov 512   ;;  %s3123_s23 = smov 32  }
  0x12   :  { %22 = dma.hbm_to_vmem [thread:$0]  %s3329_s0, 16384, %s17_s13, [#allocation4], %s3122_s22, %s3122_s22, %s3123_s23  }
  0x13   :  { %s3124_s26 = smov [#allocation6]   ;;  %s3071_s30 = scalar_lea.hbm %s3330_s1, 16384 }
  0x14   :  { %s28_s27 = sshll.u32 %s3124_s26, 4  ;;  %p3072_p8 = scmp.ne.s32.totalorder %s3330_s1, %s3071_s30  ;;  %s29_s27 = int_to_ptr.vmem [resolvable:$true] %s28_s27 }
  0x15   :  { %p3075_p9 = scmp.lt.u32.totalorder %s3071_s30, %s3330_s1 }
  0x17   :  { %p3077_p10 = pnand %p3075_p9, %p3072_p8 }
  0x19   :  { %3080 = shalt.err (!%p3077_p10)
}
  0x1a   :  { %s3081_s8 = scalar_lea.vmem %s29_s27, 16384  ;;  %p3086_p12 = scmp.lt.s32.totalorder %s29_s27, %s29_s27 }
  0x1b   :  { %p3082_p11 = scmp.ne.s32.totalorder %s29_s27, %s3081_s8  ;;  %p3087_p13 = scmp.lt.s32.totalorder %s3081_s8, %s3081_s8 }
  0x1d   :  { %p3088_p0 = por %p3087_p13, %p3086_p12 }
  0x1f   :  { %p3089_p1 = pnand %p3088_p0, %p3082_p11 }
  0x21   :  { %3092 = shalt.err (!%p3089_p1)
}
  0x22   :  { %s3125_s0 = smov 256   ;;  %s3126_s9 = smov 16  }
  0x23   :  { %34 = dma.hbm_to_vmem [thread:$0]  %s3330_s1, 16384, %s29_s27, [#allocation7], %s3125_s0, %s3125_s0, %s3126_s9  }
  0x24   :  { %3115 = dma.done.wait [#allocation4], 16384  }
  0x25   :  { %3116 = vsyncadd [#allocation4], 4294950912 }
  0x26   :  { %3117 = dma.done.wait [#allocation7], 16384  }
  0x27   :  { %3118 = vsyncadd [#allocation7], 4294950912  ;;  %v2857_v0 = vld [vmem:[#allocation6 + $0x4] ss:$16 sps:$4 sm:$0xff]   ;;  %v2859_v1 = vld [vmem:[#allocation6 + $0xc] ss:$16 sps:$4 sm:$0xff]  }
  0x28   :  { %1289 = vmatprep.subr.bf16.mxu0 %v2857_v0  ;;  %v2861_v2 = vld [vmem:[#allocation6] ss:$16 sps:$4 sm:$0xff]   ;;  %v2862_v3 = vld [vmem:[#allocation6 + $0x8] ss:$16 sps:$4 sm:$0xff]   ;;  %1675 = vmatprep.subr.bf16.mxu1 %v2859_v1  ;;  %v2863_v4 = vld [vmem:[#allocation6 + $0x24] ss:$16 sps:$4 sm:$0xff]  }
  0x29   :  { %1290 = vmatpush1.bf16.msra.mxu0 %v2861_v2  ;;  %1676 = vmatpush1.bf16.msra.mxu1 %v2862_v3  ;;  %v2865_v5 = vld [vmem:[#allocation6 + $0x2c] ss:$16 sps:$4 sm:$0xff]   ;;  %v2867_v6 = vld [vmem:[#allocation6 + $0x20] ss:$16 sps:$4 sm:$0xff]   ;;  %v2868_v7 = vld [vmem:[#allocation6 + $0x28] ss:$16 sps:$4 sm:$0xff]  }
  0x2a   :  { %1291 = vmatprep.subr.bf16.mxu0 %v2863_v4  ;;  %1677 = vmatprep.subr.bf16.mxu1 %v2865_v5  ;;  %v2869_v8 = vld [vmem:[#allocation6 + $0x44] ss:$16 sps:$4 sm:$0xff]   ;;  %v2871_v9 = vld [vmem:[#allocation6 + $0x4c] ss:$16 sps:$4 sm:$0xff]   ;;  %v2873_v10 = vld [vmem:[#allocation6 + $0x40] ss:$16 sps:$4 sm:$0xff]  }
  0x2b   :  { %v2874_v11 = vld [vmem:[#allocation6 + $0x48] ss:$16 sps:$4 sm:$0xff]   ;;  %v2875_v12 = vld [vmem:[#allocation6 + $0x64] ss:$16 sps:$4 sm:$0xff]   ;;  %v2877_v13 = vld [vmem:[#allocation6 + $0x6c] ss:$16 sps:$4 sm:$0xff]  }
  0x2c   :  { %v2879_v14 = vld [vmem:[#allocation6 + $0x60] ss:$16 sps:$4 sm:$0xff]   ;;  %v2880_v15 = vld [vmem:[#allocation6 + $0x68] ss:$16 sps:$4 sm:$0xff]   ;;  %v2881_v16 = vld [vmem:[#allocation6 + $0x84] ss:$16 sps:$4 sm:$0xff]  }
  0x2d   :  { %1292 = vmatpush1.bf16.msra.mxu0 %v2867_v6  ;;  %1678 = vmatpush1.bf16.msra.mxu1 %v2868_v7  ;;  %v2883_v17 = vld [vmem:[#allocation6 + $0x8c] ss:$16 sps:$4 sm:$0xff]   ;;  %v2885_v18 = vld [vmem:[#allocation6 + $0x80] ss:$16 sps:$4 sm:$0xff]   ;;  %v2886_v19 = vld [vmem:[#allocation6 + $0x88] ss:$16 sps:$4 sm:$0xff]  }
  0x2e   :  { %1293 = vmatprep.subr.bf16.mxu0 %v2869_v8  ;;  %1679 = vmatprep.subr.bf16.mxu1 %v2871_v9  ;;  %v2887_v20 = vld [vmem:[#allocation6 + $0xa4] ss:$16 sps:$4 sm:$0xff]   ;;  %v2889_v21 = vld [vmem:[#allocation6 + $0xac] ss:$16 sps:$4 sm:$0xff]   ;;  %v2891_v22 = vld [vmem:[#allocation6 + $0xa0] ss:$16 sps:$4 sm:$0xff]  }
  0x2f   :  { %v2892_v23 = vld [vmem:[#allocation6 + $0xa8] ss:$16 sps:$4 sm:$0xff]   ;;  %v2893_v24 = vld [vmem:[#allocation6 + $0xc4] ss:$16 sps:$4 sm:$0xff]   ;;  %v2895_v25 = vld [vmem:[#allocation6 + $0xcc] ss:$16 sps:$4 sm:$0xff]  }
  0x30   :  { %v2897_v26 = vld [vmem:[#allocation6 + $0xc0] ss:$16 sps:$4 sm:$0xff]   ;;  %v2898_v27 = vld [vmem:[#allocation6 + $0xc8] ss:$16 sps:$4 sm:$0xff]   ;;  %v2899_v28 = vld [vmem:[#allocation6 + $0xe4] ss:$16 sps:$4 sm:$0xff]  }
  0x31   :  { %1294 = vmatpush1.bf16.msra.mxu0 %v2873_v10  ;;  %1680 = vmatpush1.bf16.msra.mxu1 %v2874_v11  ;;  %v2901_v29 = vld [vmem:[#allocation6 + $0xec] ss:$16 sps:$4 sm:$0xff]   ;;  %v2903_v30 = vld [vmem:[#allocation6 + $0xe0] ss:$16 sps:$4 sm:$0xff]   ;;  %v2904_v31 = vld [vmem:[#allocation6 + $0xe8] ss:$16 sps:$4 sm:$0xff]  }
  0x32   :  { %1295 = vmatprep.subr.bf16.mxu0 %v2875_v12  ;;  %1681 = vmatprep.subr.bf16.mxu1 %v2877_v13  ;;  %v2905_v32 = vld [vmem:[#allocation6 + $0x104] ss:$16 sps:$4 sm:$0xff]   ;;  %v2907_v33 = vld [vmem:[#allocation6 + $0x10c] ss:$16 sps:$4 sm:$0xff]   ;;  %v2909_v34 = vld [vmem:[#allocation6 + $0x100] ss:$16 sps:$4 sm:$0xff]  }
  0x33   :  { %v2910_v35 = vld [vmem:[#allocation6 + $0x108] ss:$16 sps:$4 sm:$0xff]   ;;  %v2911_v36 = vld [vmem:[#allocation6 + $0x124] ss:$16 sps:$4 sm:$0xff]   ;;  %v2913_v37 = vld [vmem:[#allocation6 + $0x12c] ss:$16 sps:$4 sm:$0xff]  }
  0x34   :  { %v2915_v38 = vld [vmem:[#allocation6 + $0x120] ss:$16 sps:$4 sm:$0xff]   ;;  %v2916_v39 = vld [vmem:[#allocation6 + $0x128] ss:$16 sps:$4 sm:$0xff]   ;;  %v2917_v40 = vld [vmem:[#allocation6 + $0x144] ss:$16 sps:$4 sm:$0xff]  }
  0x35   :  { %1296 = vmatpush1.bf16.msra.mxu0 %v2879_v14  ;;  %1682 = vmatpush1.bf16.msra.mxu1 %v2880_v15  ;;  %v2919_v41 = vld [vmem:[#allocation6 + $0x14c] ss:$16 sps:$4 sm:$0xff]   ;;  %v2921_v42 = vld [vmem:[#allocation6 + $0x140] ss:$16 sps:$4 sm:$0xff]   ;;  %v2922_v43 = vld [vmem:[#allocation6 + $0x148] ss:$16 sps:$4 sm:$0xff]  }
  0x36   :  { %1297 = vmatprep.subr.bf16.mxu0 %v2881_v16  ;;  %1683 = vmatprep.subr.bf16.mxu1 %v2883_v17  ;;  %v2923_v44 = vld [vmem:[#allocation6 + $0x164] ss:$16 sps:$4 sm:$0xff]   ;;  %v2925_v45 = vld [vmem:[#allocation6 + $0x16c] ss:$16 sps:$4 sm:$0xff]   ;;  %v2927_v47 = vld [vmem:[#allocation6 + $0x160] ss:$16 sps:$4 sm:$0xff]  }
  0x37   :  { %v330_v46 = vld [vmem:[#allocation3 + $0x8] sm:$0xff]  ;;  %v2929_v50 = vld [vmem:[#allocation6 + $0x184] ss:$16 sps:$4 sm:$0xff]   ;;  %v2933_v53 = vld [vmem:[#allocation6 + $0x180] ss:$16 sps:$4 sm:$0xff]  }
  0x38   :  { %v2928_v48 = vld [vmem:[#allocation6 + $0x168] ss:$16 sps:$4 sm:$0xff]   ;;  %v2931_v52 = vld [vmem:[#allocation6 + $0x18c] ss:$16 sps:$4 sm:$0xff]   ;;  %v2935_v55 = vld [vmem:[#allocation6 + $0x1a4] ss:$16 sps:$4 sm:$0xff]  }
  0x39   :  { %1298 = vmatpush1.bf16.msra.mxu0 %v2885_v18  ;;  %1684 = vmatpush1.bf16.msra.mxu1 %v2886_v19  ;;  %v334_v49 = vld [vmem:[#allocation3 + $0x28] sm:$0xff]  ;;  %v2939_v57 = vld [vmem:[#allocation6 + $0x1a0] ss:$16 sps:$4 sm:$0xff]   ;;  %v2941_v59 = vld [vmem:[#allocation6 + $0x1c4] ss:$16 sps:$4 sm:$0xff]  }
  0x3a   :  { %1299 = vmatprep.subr.bf16.mxu0 %v2887_v20  ;;  %1685 = vmatprep.subr.bf16.mxu1 %v2889_v21  ;;  %v458_v51 = vpack.c.bf16 %v334_v49, %v330_v46  ;;  %v2934_v54 = vld [vmem:[#allocation6 + $0x188] ss:$16 sps:$4 sm:$0xff]   ;;  %v2937_v56 = vld [vmem:[#allocation6 + $0x1ac] ss:$16 sps:$4 sm:$0xff]   ;;  %v2945_v61 = vld [vmem:[#allocation6 + $0x1c0] ss:$16 sps:$4 sm:$0xff]  }
  0x3b   :  { %v2940_v58 = vld [vmem:[#allocation6 + $0x1a8] ss:$16 sps:$4 sm:$0xff]   ;;  %v2943_v60 = vld [vmem:[#allocation6 + $0x1cc] ss:$16 sps:$4 sm:$0xff]   ;;  %v2947_v63 = vld [vmem:[#allocation6 + $0x1e4] ss:$16 sps:$4 sm:$0xff]  }
  0x3c   :  { %1321 = vmatprep.mubr.bf16.mxu0 %v458_v51  ;;  %1707 = vmatprep.mubr.bf16.mxu1 %v458_v51  ;;  %v2946_v62 = vld [vmem:[#allocation6 + $0x1c8] ss:$16 sps:$4 sm:$0xff]   ;;  %v2949_v0 = vld [vmem:[#allocation6 + $0x1ec] ss:$16 sps:$4 sm:$0xff]   ;;  %v2951_v1 = vld [vmem:[#allocation6 + $0x1e0] ss:$16 sps:$4 sm:$0xff]  }
  0x3d   :  { %1300 = vmatpush1.bf16.msra.mxu0 %v2891_v22  ;;  %1686 = vmatpush1.bf16.msra.mxu1 %v2892_v23  ;;  %v2952_v2 = vld [vmem:[#allocation6 + $0x1e8] ss:$16 sps:$4 sm:$0xff]   ;;  %v329_v3 = vld [vmem:[#allocation3] sm:$0xff]  ;;  %v2958_v6 = vld [vmem:[#allocation6 + $0x20c] ss:$16 sps:$4 sm:$0xff]  }
  0x3e   :  { %1301 = vmatprep.subr.bf16.mxu0 %v2893_v24  ;;  %1687 = vmatprep.subr.bf16.mxu1 %v2895_v25  ;;  %v333_v4 = vld [vmem:[#allocation3 + $0x20] sm:$0xff]  ;;  %v338_v7 = vld [vmem:[#allocation3 + $0x48] sm:$0xff] }
  0x3f   :  { %v2955_v5 = vld [vmem:[#allocation6 + $0x204] ss:$16 sps:$4 sm:$0xff]   ;;  %v342_v8 = vld [vmem:[#allocation3 + $0x68] sm:$0xff]  ;;  %v457_v9 = vpack.c.bf16 %v333_v4, %v329_v3  ;;  %v2953_v10 = vld [vmem:[#allocation6 + $0x200] ss:$16 sps:$4 sm:$0xff]  }
  0x40   :  { %v2956_v11 = vld [vmem:[#allocation6 + $0x208] ss:$16 sps:$4 sm:$0xff]   ;;  %v462_v12 = vpack.c.bf16 %v342_v8, %v338_v7  ;;  %v337_v13 = vld [vmem:[#allocation3 + $0x40] sm:$0xff]  ;;  %v2964_v17 = vld [vmem:[#allocation6 + $0x22c] ss:$16 sps:$4 sm:$0xff]  }
  0x41   :  { %1302 = vmatpush1.bf16.msra.mxu0 %v2897_v26  ;;  %1688 = vmatpush1.bf16.msra.mxu1 %v2898_v27  ;;  %v341_v14 = vld [vmem:[#allocation3 + $0x60] sm:$0xff]  ;;  %v2962_v18 = vld [vmem:[#allocation6 + $0x228] ss:$16 sps:$4 sm:$0xff]   ;;  %v2970_v22 = vld [vmem:[#allocation6 + $0x24c] ss:$16 sps:$4 sm:$0xff]  }
  0x42   :  { %1303 = vmatprep.subr.bf16.mxu0 %v2899_v28  ;;  %1689 = vmatprep.subr.bf16.mxu1 %v2901_v29  ;;  %v2959_v15 = vld [vmem:[#allocation6 + $0x220] ss:$16 sps:$4 sm:$0xff]   ;;  %v2961_v16 = vld [vmem:[#allocation6 + $0x224] ss:$16 sps:$4 sm:$0xff]   ;;  %v346_v19 = vld [vmem:[#allocation3 + $0x88] sm:$0xff]  ;;  %v461_v23 = vpack.c.bf16 %v341_v14, %v337_v13 }
  0x43   :  { %v350_v20 = vld [vmem:[#allocation3 + $0xa8] sm:$0xff]  ;;  %v2967_v21 = vld [vmem:[#allocation6 + $0x244] ss:$16 sps:$4 sm:$0xff]   ;;  %v2965_v25 = vld [vmem:[#allocation6 + $0x240] ss:$16 sps:$4 sm:$0xff]  }
  0x44   :  { %v466_v24 = vpack.c.bf16 %v350_v20, %v346_v19  ;;  %v2968_v26 = vld [vmem:[#allocation6 + $0x248] ss:$16 sps:$4 sm:$0xff]   ;;  %v345_v27 = vld [vmem:[#allocation3 + $0x80] sm:$0xff]  ;;  %v2976_v29 = vld [vmem:[#allocation6 + $0x26c] ss:$16 sps:$4 sm:$0xff]  }
  0x45   :  { %1304 = vmatpush1.bf16.msra.mxu0 %v2903_v30  ;;  %1690 = vmatpush1.bf16.msra.mxu1 %v2904_v31  ;;  %v2973_v28 = vld [vmem:[#allocation6 + $0x264] ss:$16 sps:$4 sm:$0xff]   ;;  %v354_v31 = vld [vmem:[#allocation3 + $0xc8] sm:$0xff]  ;;  %v3001_v3 = vld [vmem:[#allocation6 + $0x300] ss:$16 sps:$4 sm:$0xff]  }
  0x46   :  { %1305 = vmatprep.subr.bf16.mxu0 %v2905_v32  ;;  %1691 = vmatprep.subr.bf16.mxu1 %v2907_v33  ;;  %v349_v30 = vld [vmem:[#allocation3 + $0xa0] sm:$0xff]  ;;  %v358_v32 = vld [vmem:[#allocation3 + $0xe8] sm:$0xff] }
  0x47   :  { %v2971_v33 = vld [vmem:[#allocation6 + $0x260] ss:$16 sps:$4 sm:$0xff]   ;;  %v366_v46 = vld [vmem:[#allocation3 + $0x128] sm:$0xff]  ;;  %v2991_v49 = vld [vmem:[#allocation6 + $0x2c4] ss:$16 sps:$4 sm:$0xff]  }
  0x48   :  { %v3004_v4 = vld [vmem:[#allocation6 + $0x308] ss:$16 sps:$4 sm:$0xff]   ;;  %v3012_v7 = vld [vmem:[#allocation6 + $0x32c] ss:$16 sps:$4 sm:$0xff]   ;;  %v373_v8 = vld [vmem:[#allocation3 + $0x160] sm:$0xff] }
  0x49   :  { %1306 = vmatpush1.bf16.msra.mxu0 %v2909_v34  ;;  %1692 = vmatpush1.bf16.msra.mxu1 %v2910_v35  ;;  %v2974_v34 = vld [vmem:[#allocation6 + $0x268] ss:$16 sps:$4 sm:$0xff]   ;;  %v2979_v35 = vld [vmem:[#allocation6 + $0x284] ss:$16 sps:$4 sm:$0xff]   ;;  %v3018_v14 = vld [vmem:[#allocation6 + $0x34c] ss:$16 sps:$4 sm:$0xff]  }
  0x4a   :  { %1307 = vmatprep.subr.bf16.mxu0 %v2911_v36  ;;  %1693 = vmatprep.subr.bf16.mxu1 %v2913_v37  ;;  %v2982_v36 = vld [vmem:[#allocation6 + $0x28c] ss:$16 sps:$4 sm:$0xff]   ;;  %v465_v37 = vpack.c.bf16 %v349_v30, %v345_v27  ;;  %v3015_v13 = vld [vmem:[#allocation6 + $0x344] ss:$16 sps:$4 sm:$0xff]  }
  0x4b   :  { %v3021_v19 = vld [vmem:[#allocation6 + $0x364] ss:$16 sps:$4 sm:$0xff]   ;;  %v3024_v20 = vld [vmem:[#allocation6 + $0x36c] ss:$16 sps:$4 sm:$0xff]  }
  0x4c   :  { %v3027_v27 = vld [vmem:[#allocation6 + $0x384] ss:$16 sps:$4 sm:$0xff]  }
  0x4d   :  { %1308 = vmatpush1.bf16.msra.mxu0 %v2915_v38  ;;  %1694 = vmatpush1.bf16.msra.mxu1 %v2916_v39  ;;  %v470_v38 = vpack.c.bf16 %v358_v32, %v354_v31  ;;  %v2977_v39 = vld [vmem:[#allocation6 + $0x280] ss:$16 sps:$4 sm:$0xff]   ;;  %v3028_v32 = vld [vmem:[#allocation6 + $0x388] ss:$16 sps:$4 sm:$0xff]  }
  0x4e   :  { %1309 = vmatprep.subr.bf16.mxu0 %v2917_v40  ;;  %1695 = vmatprep.subr.bf16.mxu1 %v2919_v41  ;;  %v2980_v40 = vld [vmem:[#allocation6 + $0x288] ss:$16 sps:$4 sm:$0xff]   ;;  %v353_v41 = vld [vmem:[#allocation3 + $0xc0] sm:$0xff] }
  0x4f   :  { %v3025_v31 = vld [vmem:[#allocation6 + $0x380] ss:$16 sps:$4 sm:$0xff]  }
  0x51   :  { %1310 = vmatpush1.bf16.msra.mxu0 %v2921_v42  ;;  %1696 = vmatpush1.bf16.msra.mxu1 %v2922_v43  ;;  %v2985_v42 = vld [vmem:[#allocation6 + $0x2a4] ss:$16 sps:$4 sm:$0xff]   ;;  %v2988_v43 = vld [vmem:[#allocation6 + $0x2ac] ss:$16 sps:$4 sm:$0xff]  }
  0x52   :  { %1311 = vmatprep.subr.bf16.mxu0 %v2923_v44  ;;  %1697 = vmatprep.subr.bf16.mxu1 %v2925_v45  ;;  %v357_v44 = vld [vmem:[#allocation3 + $0xe0] sm:$0xff]  ;;  %v362_v45 = vld [vmem:[#allocation3 + $0x108] sm:$0xff] }
  0x53   :  { %v469_v51 = vpack.c.bf16 %v357_v44, %v353_v41  ;;  %v3039_v41 = vld [vmem:[#allocation6 + $0x3c4] ss:$16 sps:$4 sm:$0xff]  }
  0x55   :  { %1312 = vmatpush1.bf16.msra.mxu0 %v2927_v47  ;;  %1698 = vmatpush1.bf16.msra.mxu1 %v2928_v48  ;;  %v2983_v47 = vld [vmem:[#allocation6 + $0x2a0] ss:$16 sps:$4 sm:$0xff]   ;;  %v2986_v48 = vld [vmem:[#allocation6 + $0x2a8] ss:$16 sps:$4 sm:$0xff]  }
  0x56   :  { %1313 = vmatprep.subr.bf16.mxu0 %v2929_v50  ;;  %1699 = vmatprep.subr.bf16.mxu1 %v2931_v52  ;;  %v2994_v50 = vld [vmem:[#allocation6 + $0x2cc] ss:$16 sps:$4 sm:$0xff]   ;;  %v474_v52 = vpack.c.bf16 %v366_v46, %v362_v45  ;;  %v3037_v45 = vld [vmem:[#allocation6 + $0x3c0] ss:$16 sps:$4 sm:$0xff]   ;;  %v3040_v46 = vld [vmem:[#allocation6 + $0x3c8] ss:$16 sps:$4 sm:$0xff]  }
  0x59   :  { %1314 = vmatpush1.bf16.msra.mxu0 %v2933_v53  ;;  %1700 = vmatpush1.bf16.msra.mxu1 %v2934_v54  ;;  %v2989_v53 = vld [vmem:[#allocation6 + $0x2c0] ss:$16 sps:$4 sm:$0xff]   ;;  %v2992_v54 = vld [vmem:[#allocation6 + $0x2c8] ss:$16 sps:$4 sm:$0xff]  }
  0x5a   :  { %1315 = vmatprep.subr.bf16.mxu0 %v2935_v55  ;;  %1701 = vmatprep.subr.bf16.mxu1 %v2937_v56  ;;  %v361_v55 = vld [vmem:[#allocation3 + $0x100] sm:$0xff] }
  0x5b   :  { %v2997_v56 = vld [vmem:[#allocation6 + $0x2e4] ss:$16 sps:$4 sm:$0xff]  }
  0x5d   :  { %1316 = vmatpush1.bf16.msra.mxu0 %v2939_v57  ;;  %1702 = vmatpush1.bf16.msra.mxu1 %v2940_v58  ;;  %v3000_v57 = vld [vmem:[#allocation6 + $0x2ec] ss:$16 sps:$4 sm:$0xff]   ;;  %v365_v58 = vld [vmem:[#allocation3 + $0x120] sm:$0xff] }
  0x5e   :  { %1317 = vmatprep.subr.bf16.mxu0 %v2941_v59  ;;  %1703 = vmatprep.subr.bf16.mxu1 %v2943_v60  ;;  %v370_v59 = vld [vmem:[#allocation3 + $0x148] sm:$0xff] }
  0x5f   :  { %v374_v60 = vld [vmem:[#allocation3 + $0x168] sm:$0xff] }
  0x61   :  { %1318 = vmatpush1.bf16.msra.mxu0 %v2945_v61  ;;  %1704 = vmatpush1.bf16.msra.mxu1 %v2946_v62  ;;  %v2995_v61 = vld [vmem:[#allocation6 + $0x2e0] ss:$16 sps:$4 sm:$0xff]   ;;  %v2998_v62 = vld [vmem:[#allocation6 + $0x2e8] ss:$16 sps:$4 sm:$0xff]  }
  0x62   :  { %1319 = vmatprep.subr.bf16.mxu0 %v2947_v63  ;;  %1705 = vmatprep.subr.bf16.mxu1 %v2949_v0  ;;  %v3003_v63 = vld [vmem:[#allocation6 + $0x304] ss:$16 sps:$4 sm:$0xff]   ;;  %v3006_v0 = vld [vmem:[#allocation6 + $0x30c] ss:$16 sps:$4 sm:$0xff]  }
  0x65   :  { %1320 = vmatpush1.bf16.msra.mxu0 %v2951_v1  ;;  %1706 = vmatpush1.bf16.msra.mxu1 %v2952_v2  ;;  %v473_v1 = vpack.c.bf16 %v365_v58, %v361_v55  ;;  %v478_v2 = vpack.c.bf16 %v374_v60, %v370_v59  ;;  %v405_v58 = vld [vmem:[#allocation3 + $0x260] sm:$0xff]  ;;  %v410_v59 = vld [vmem:[#allocation3 + $0x288] sm:$0xff] }
  0x66   :  { %1482 = vmatprep.subr.bf16.mxu0 %v2955_v5  ;;  %1868 = vmatprep.subr.bf16.mxu1 %v2958_v6  ;;  %v369_v5 = vld [vmem:[#allocation3 + $0x140] sm:$0xff]  ;;  %v414_v60 = vld [vmem:[#allocation3 + $0x2a8] sm:$0xff] }
  0x67   :  { %v3009_v6 = vld [vmem:[#allocation6 + $0x324] ss:$16 sps:$4 sm:$0xff]  }
  0x68   :  { %1322 = vmatmul.mubr.bf16.vlgmr.msra.gmra.mrb[0].mxu0 %v457_v9  ;;  %1708 = vmatmul.mubr.bf16.vlgmr.msra.gmra.mrb[0].mxu1 %v457_v9  ;;  %v378_v9 = vld [vmem:[#allocation3 + $0x188] sm:$0xff] }
  0x69   :  { %1483 = vmatpush1.bf16.msra.mxu0 %v2953_v10  ;;  %1869 = vmatpush1.bf16.msra.mxu1 %v2956_v11  ;;  %v382_v10 = vld [vmem:[#allocation3 + $0x1a8] sm:$0xff]  ;;  %v3007_v11 = vld [vmem:[#allocation6 + $0x320] ss:$16 sps:$4 sm:$0xff]  }
  0x6a   :  { %1331 = vmatprep.mubr.bf16.mxu0 %v462_v12  ;;  %1717 = vmatprep.mubr.bf16.mxu1 %v462_v12  ;;  %v3010_v12 = vld [vmem:[#allocation6 + $0x328] ss:$16 sps:$4 sm:$0xff]  }
  0x6b   :  { %1484 = vmatprep.subr.bf16.mxu0 %v2961_v16  ;;  %1870 = vmatprep.subr.bf16.mxu1 %v2964_v17  ;;  %v482_v16 = vpack.c.bf16 %v382_v10, %v378_v9  ;;  %v3013_v17 = vld [vmem:[#allocation6 + $0x340] ss:$16 sps:$4 sm:$0xff]  }
  0x6d   :  { %1485 = vmatpush1.bf16.msra.mxu0 %v2959_v15  ;;  %1871 = vmatpush1.bf16.msra.mxu1 %v2962_v18  ;;  %v477_v15 = vpack.c.bf16 %v373_v8, %v369_v5  ;;  %v3016_v18 = vld [vmem:[#allocation6 + $0x348] ss:$16 sps:$4 sm:$0xff]   ;;  %v417_v5 = vld [vmem:[#allocation3 + $0x2c0] sm:$0xff] }
  0x6e   :  { %1486 = vmatprep.subr.bf16.mxu0 %v2967_v21  ;;  %1872 = vmatprep.subr.bf16.mxu1 %v2970_v22  ;;  %v377_v21 = vld [vmem:[#allocation3 + $0x180] sm:$0xff]  ;;  %v430_v8 = vld [vmem:[#allocation3 + $0x328] sm:$0xff] }
  0x6f   :  { %v381_v22 = vld [vmem:[#allocation3 + $0x1a0] sm:$0xff] }
  0x70   :  { %1332 = vmatmul.mubr.bf16.gmra.mrb[4].mxu0 %v461_v23  ;;  %1718 = vmatmul.mubr.bf16.gmra.mrb[4].mxu1 %v461_v23  ;;  %v386_v23 = vld [vmem:[#allocation3 + $0x1c8] sm:$0xff] }
  0x71   :  { %1341 = vmatprep.mubr.bf16.mxu0 %v466_v24  ;;  %1727 = vmatprep.mubr.bf16.mxu1 %v466_v24  ;;  %v390_v24 = vld [vmem:[#allocation3 + $0x1e8] sm:$0xff] }
  0x72   :  { %1487 = vmatpush1.bf16.msra.mxu0 %v2965_v25  ;;  %1873 = vmatpush1.bf16.msra.mxu1 %v2968_v26  ;;  %v3019_v25 = vld [vmem:[#allocation6 + $0x360] ss:$16 sps:$4 sm:$0xff]   ;;  %v3022_v26 = vld [vmem:[#allocation6 + $0x368] ss:$16 sps:$4 sm:$0xff]   ;;  %v486_v30 = vpack.c.bf16 %v390_v24, %v386_v23 }
  0x73   :  { %1488 = vmatprep.subr.bf16.mxu0 %v2973_v28  ;;  %1874 = vmatprep.subr.bf16.mxu1 %v2976_v29  ;;  %v3030_v28 = vld [vmem:[#allocation6 + $0x38c] ss:$16 sps:$4 sm:$0xff]   ;;  %v481_v29 = vpack.c.bf16 %v381_v22, %v377_v21  ;;  %v441_v23 = vld [vmem:[#allocation3 + $0x380] sm:$0xff] }
  0x74   :  { %v445_v24 = vld [vmem:[#allocation3 + $0x3a0] sm:$0xff] }
  0x76   :  { %1489 = vmatpush1.bf16.msra.mxu0 %v2971_v33  ;;  %1875 = vmatpush1.bf16.msra.mxu1 %v2974_v34  ;;  %v3033_v33 = vld [vmem:[#allocation6 + $0x3a4] ss:$16 sps:$4 sm:$0xff]   ;;  %v3036_v34 = vld [vmem:[#allocation6 + $0x3ac] ss:$16 sps:$4 sm:$0xff]  }
  0x77   :  { %1490 = vmatprep.subr.bf16.mxu0 %v2979_v35  ;;  %1876 = vmatprep.subr.bf16.mxu1 %v2982_v36  ;;  %v385_v35 = vld [vmem:[#allocation3 + $0x1c0] sm:$0xff] }
  0x78   :  { %1342 = vmatmul.mubr.bf16.gmra.mrb[8].mxu0 %v465_v37  ;;  %1728 = vmatmul.mubr.bf16.gmra.mrb[8].mxu1 %v465_v37  ;;  %v389_v36 = vld [vmem:[#allocation3 + $0x1e0] sm:$0xff]  ;;  %v394_v37 = vld [vmem:[#allocation3 + $0x208] sm:$0xff] }
  0x79   :  { %1351 = vmatprep.mubr.bf16.mxu0 %v470_v38  ;;  %1737 = vmatprep.mubr.bf16.mxu1 %v470_v38  ;;  %v398_v38 = vld [vmem:[#allocation3 + $0x228] sm:$0xff] }
  0x7a   :  { %1491 = vmatpush1.bf16.msra.mxu0 %v2977_v39  ;;  %1877 = vmatpush1.bf16.msra.mxu1 %v2980_v40  ;;  %v3031_v39 = vld [vmem:[#allocation6 + $0x3a0] ss:$16 sps:$4 sm:$0xff]   ;;  %v3034_v40 = vld [vmem:[#allocation6 + $0x3a8] ss:$16 sps:$4 sm:$0xff]   ;;  %v490_v44 = vpack.c.bf16 %v398_v38, %v394_v37 }
  0x7b   :  { %1492 = vmatprep.subr.bf16.mxu0 %v2985_v42  ;;  %1878 = vmatprep.subr.bf16.mxu1 %v2988_v43  ;;  %v3042_v42 = vld [vmem:[#allocation6 + $0x3cc] ss:$16 sps:$4 sm:$0xff]   ;;  %v485_v43 = vpack.c.bf16 %v389_v36, %v385_v35  ;;  %v331_v35 = vld [vmem:[#allocation3 + $0x10] sm:$0xff] }
  0x7c   :  { %v335_v36 = vld [vmem:[#allocation3 + $0x30] sm:$0xff]  ;;  %v340_v37 = vld [vmem:[#allocation3 + $0x58] sm:$0xff] }
  0x7d   :  { %v344_v38 = vld [vmem:[#allocation3 + $0x78] sm:$0xff] }
  0x7e   :  { %1493 = vmatpush1.bf16.msra.mxu0 %v2983_v47  ;;  %1879 = vmatpush1.bf16.msra.mxu1 %v2986_v48  ;;  %v3045_v47 = vld [vmem:[#allocation6 + $0x3e4] ss:$16 sps:$4 sm:$0xff]   ;;  %v3048_v48 = vld [vmem:[#allocation6 + $0x3ec] ss:$16 sps:$4 sm:$0xff]  }
  0x7f   :  { %1494 = vmatprep.subr.bf16.mxu0 %v2991_v49  ;;  %1880 = vmatprep.subr.bf16.mxu1 %v2994_v50  ;;  %v393_v49 = vld [vmem:[#allocation3 + $0x200] sm:$0xff] }
  0x80   :  { %1352 = vmatmul.mubr.bf16.gmra.mrb[12].mxu0 %v469_v51  ;;  %1738 = vmatmul.mubr.bf16.gmra.mrb[12].mxu1 %v469_v51  ;;  %v397_v50 = vld [vmem:[#allocation3 + $0x220] sm:$0xff]  ;;  %v402_v51 = vld [vmem:[#allocation3 + $0x248] sm:$0xff] }
  0x81   :  { %1361 = vmatprep.mubr.bf16.mxu0 %v474_v52  ;;  %1747 = vmatprep.mubr.bf16.mxu1 %v474_v52  ;;  %v406_v52 = vld [vmem:[#allocation3 + $0x268] sm:$0xff]  ;;  %v489_v55 = vpack.c.bf16 %v397_v50, %v393_v49  ;;  %v356_v49 = vld [vmem:[#allocation3 + $0xd8] sm:$0xff] }
  0x82   :  { %1495 = vmatpush1.bf16.msra.mxu0 %v2989_v53  ;;  %1881 = vmatpush1.bf16.msra.mxu1 %v2992_v54  ;;  %v3043_v53 = vld [vmem:[#allocation6 + $0x3e0] ss:$16 sps:$4 sm:$0xff]   ;;  %v3046_v54 = vld [vmem:[#allocation6 + $0x3e8] ss:$16 sps:$4 sm:$0xff]  }
  0x83   :  { %1496 = vmatprep.subr.bf16.mxu0 %v2997_v56  ;;  %1882 = vmatprep.subr.bf16.mxu1 %v3000_v57  ;;  %v494_v56 = vpack.c.bf16 %v406_v52, %v402_v51  ;;  %v401_v57 = vld [vmem:[#allocation3 + $0x240] sm:$0xff]  ;;  %v360_v50 = vld [vmem:[#allocation3 + $0xf8] sm:$0xff] }
  0x84   :  { %v472_v52 = vpack.c.bf16 %v360_v50, %v356_v49  ;;  %v435_v49 = vld [vmem:[#allocation3 + $0x350] sm:$0xff] }
  0x85   :  { %v439_v50 = vld [vmem:[#allocation3 + $0x370] sm:$0xff] }
  0x86   :  { %1497 = vmatpush1.bf16.msra.mxu0 %v2995_v61  ;;  %1883 = vmatpush1.bf16.msra.mxu1 %v2998_v62  ;;  %v493_v61 = vpack.c.bf16 %v405_v58, %v401_v57  ;;  %v498_v62 = vpack.c.bf16 %v414_v60, %v410_v59  ;;  %v363_v59 = vld [vmem:[#allocation3 + $0x110] sm:$0xff] }
  0x87   :  { %1498 = vmatprep.subr.bf16.mxu0 %v3003_v63  ;;  %1884 = vmatprep.subr.bf16.mxu1 %v3006_v0  ;;  %v409_v63 = vld [vmem:[#allocation3 + $0x280] sm:$0xff]  ;;  %v367_v60 = vld [vmem:[#allocation3 + $0x130] sm:$0xff] }
  0x88   :  { %1362 = vmatmul.mubr.bf16.gmra.mrb[16].mxu0 %v473_v1  ;;  %1748 = vmatmul.mubr.bf16.gmra.mrb[16].mxu1 %v473_v1  ;;  %v413_v0 = vld [vmem:[#allocation3 + $0x2a0] sm:$0xff]  ;;  %v418_v1 = vld [vmem:[#allocation3 + $0x2c8] sm:$0xff] }
  0x89   :  { %1371 = vmatprep.mubr.bf16.mxu0 %v478_v2  ;;  %1757 = vmatprep.mubr.bf16.mxu1 %v478_v2  ;;  %v422_v2 = vld [vmem:[#allocation3 + $0x2e8] sm:$0xff] }
  0x8a   :  { %1499 = vmatpush1.bf16.msra.mxu0 %v3001_v3  ;;  %1885 = vmatpush1.bf16.msra.mxu1 %v3004_v4  ;;  %v497_v3 = vpack.c.bf16 %v413_v0, %v409_v63  ;;  %v502_v4 = vpack.c.bf16 %v422_v2, %v418_v1  ;;  %v475_v63 = vpack.c.bf16 %v367_v60, %v363_v59  ;;  %v371_v1 = vld [vmem:[#allocation3 + $0x150] sm:$0xff] }
  0x8b   :  { %1500 = vmatprep.subr.bf16.mxu0 %v3009_v6  ;;  %1886 = vmatprep.subr.bf16.mxu1 %v3012_v7  ;;  %v421_v6 = vld [vmem:[#allocation3 + $0x2e0] sm:$0xff]  ;;  %v426_v7 = vld [vmem:[#allocation3 + $0x308] sm:$0xff]  ;;  %v375_v2 = vld [vmem:[#allocation3 + $0x170] sm:$0xff] }
  0x8c   :  { %v501_v9 = vpack.c.bf16 %v421_v6, %v417_v5  ;;  %v506_v10 = vpack.c.bf16 %v430_v8, %v426_v7  ;;  %v479_v5 = vpack.c.bf16 %v375_v2, %v371_v1  ;;  %v379_v7 = vld [vmem:[#allocation3 + $0x190] sm:$0xff] }
  0x8d   :  { %v383_v8 = vld [vmem:[#allocation3 + $0x1b0] sm:$0xff] }
  0x8e   :  { %1501 = vmatpush1.bf16.msra.mxu0 %v3007_v11  ;;  %1887 = vmatpush1.bf16.msra.mxu1 %v3010_v12  ;;  %v425_v11 = vld [vmem:[#allocation3 + $0x300] sm:$0xff] }
  0x8f   :  { %1502 = vmatprep.subr.bf16.mxu0 %v3015_v13  ;;  %1888 = vmatprep.subr.bf16.mxu1 %v3018_v14  ;;  %v429_v12 = vld [vmem:[#allocation3 + $0x320] sm:$0xff]  ;;  %v434_v13 = vld [vmem:[#allocation3 + $0x348] sm:$0xff] }
  0x90   :  { %1372 = vmatmul.mubr.bf16.gmra.mrb[20].mxu0 %v477_v15  ;;  %1758 = vmatmul.mubr.bf16.gmra.mrb[20].mxu1 %v477_v15  ;;  %v438_v14 = vld [vmem:[#allocation3 + $0x368] sm:$0xff]  ;;  %v505_v15 = vpack.c.bf16 %v429_v12, %v425_v11  ;;  %v483_v11 = vpack.c.bf16 %v383_v8, %v379_v7 }
  0x91   :  { %1381 = vmatprep.mubr.bf16.mxu0 %v482_v16  ;;  %1767 = vmatprep.mubr.bf16.mxu1 %v482_v16  ;;  %v510_v16 = vpack.c.bf16 %v438_v14, %v434_v13  ;;  %v387_v13 = vld [vmem:[#allocation3 + $0x1d0] sm:$0xff] }
  0x92   :  { %1503 = vmatpush1.bf16.msra.mxu0 %v3013_v17  ;;  %1889 = vmatpush1.bf16.msra.mxu1 %v3016_v18  ;;  %v433_v17 = vld [vmem:[#allocation3 + $0x340] sm:$0xff]  ;;  %v391_v14 = vld [vmem:[#allocation3 + $0x1f0] sm:$0xff] }
  0x93   :  { %1504 = vmatprep.subr.bf16.mxu0 %v3021_v19  ;;  %1890 = vmatprep.subr.bf16.mxu1 %v3024_v20  ;;  %v437_v18 = vld [vmem:[#allocation3 + $0x360] sm:$0xff]  ;;  %v442_v19 = vld [vmem:[#allocation3 + $0x388] sm:$0xff] }
  0x94   :  { %v446_v20 = vld [vmem:[#allocation3 + $0x3a8] sm:$0xff]  ;;  %v509_v21 = vpack.c.bf16 %v437_v18, %v433_v17  ;;  %v487_v17 = vpack.c.bf16 %v391_v14, %v387_v13 }
  0x95   :  { %v514_v22 = vpack.c.bf16 %v446_v20, %v442_v19  ;;  %v395_v19 = vld [vmem:[#allocation3 + $0x210] sm:$0xff] }
  0x96   :  { %1505 = vmatpush1.bf16.msra.mxu0 %v3019_v25  ;;  %1891 = vmatpush1.bf16.msra.mxu1 %v3022_v26  ;;  %v450_v25 = vld [vmem:[#allocation3 + $0x3c8] sm:$0xff]  ;;  %v399_v20 = vld [vmem:[#allocation3 + $0x230] sm:$0xff] }
  0x97   :  { %1506 = vmatprep.subr.bf16.mxu0 %v3027_v27  ;;  %1892 = vmatprep.subr.bf16.mxu1 %v3030_v28  ;;  %v454_v26 = vld [vmem:[#allocation3 + $0x3e8] sm:$0xff]  ;;  %v513_v27 = vpack.c.bf16 %v445_v24, %v441_v23  ;;  %v491_v23 = vpack.c.bf16 %v399_v20, %v395_v19 }
  0x98   :  { %1382 = vmatmul.mubr.bf16.gmra.mrb[24].mxu0 %v481_v29  ;;  %1768 = vmatmul.mubr.bf16.gmra.mrb[24].mxu1 %v481_v29  ;;  %v518_v28 = vpack.c.bf16 %v454_v26, %v450_v25  ;;  %v449_v29 = vld [vmem:[#allocation3 + $0x3c0] sm:$0xff]  ;;  %v403_v25 = vld [vmem:[#allocation3 + $0x250] sm:$0xff] }
  0x99   :  { %1391 = vmatprep.mubr.bf16.mxu0 %v486_v30  ;;  %1777 = vmatprep.mubr.bf16.mxu1 %v486_v30  ;;  %v453_v30 = vld [vmem:[#allocation3 + $0x3e0] sm:$0xff]  ;;  %v407_v26 = vld [vmem:[#allocation3 + $0x270] sm:$0xff] }
  0x9a   :  { %1507 = vmatpush1.bf16.msra.mxu0 %v3025_v31  ;;  %1893 = vmatpush1.bf16.msra.mxu1 %v3028_v32  ;;  %v332_v31 = vld [vmem:[#allocation3 + $0x18] sm:$0xff] }
  0x9b   :  { %1508 = vmatprep.subr.bf16.mxu0 %v3033_v33  ;;  %1894 = vmatprep.subr.bf16.mxu1 %v3036_v34  ;;  %v336_v32 = vld [vmem:[#allocation3 + $0x38] sm:$0xff]  ;;  %v517_v33 = vpack.c.bf16 %v453_v30, %v449_v29  ;;  %v495_v29 = vpack.c.bf16 %v407_v26, %v403_v25 }
  0x9c   :  { %v460_v34 = vpack.c.bf16 %v336_v32, %v332_v31  ;;  %v411_v31 = vld [vmem:[#allocation3 + $0x290] sm:$0xff] }
  0x9d   :  { %v415_v32 = vld [vmem:[#allocation3 + $0x2b0] sm:$0xff] }
  0x9e   :  { %1509 = vmatpush1.bf16.msra.mxu0 %v3031_v39  ;;  %1895 = vmatpush1.bf16.msra.mxu1 %v3034_v40  ;;  %v459_v39 = vpack.c.bf16 %v335_v36, %v331_v35  ;;  %v464_v40 = vpack.c.bf16 %v344_v38, %v340_v37  ;;  %v499_v35 = vpack.c.bf16 %v415_v32, %v411_v31  ;;  %v419_v37 = vld [vmem:[#allocation3 + $0x2d0] sm:$0xff] }
  0x9f   :  { %1510 = vmatprep.subr.bf16.mxu0 %v3039_v41  ;;  %1896 = vmatprep.subr.bf16.mxu1 %v3042_v42  ;;  %v339_v41 = vld [vmem:[#allocation3 + $0x50] sm:$0xff] }
  0xa0   :  { %1392 = vmatmul.mubr.bf16.gmra.mrb[28].mxu0 %v485_v43  ;;  %1778 = vmatmul.mubr.bf16.gmra.mrb[28].mxu1 %v485_v43  ;;  %v343_v42 = vld [vmem:[#allocation3 + $0x70] sm:$0xff]  ;;  %v348_v43 = vld [vmem:[#allocation3 + $0x98] sm:$0xff] }
  0xa1   :  { %1401 = vmatprep.mubr.bf16.mxu0 %v490_v44  ;;  %1787 = vmatprep.mubr.bf16.mxu1 %v490_v44  ;;  %v352_v44 = vld [vmem:[#allocation3 + $0xb8] sm:$0xff]  ;;  %v423_v38 = vld [vmem:[#allocation3 + $0x2f0] sm:$0xff] }
  0xa2   :  { %1511 = vmatpush1.bf16.msra.mxu0 %v3037_v45  ;;  %1897 = vmatpush1.bf16.msra.mxu1 %v3040_v46  ;;  %v463_v45 = vpack.c.bf16 %v343_v42, %v339_v41  ;;  %v468_v46 = vpack.c.bf16 %v352_v44, %v348_v43  ;;  %v503_v41 = vpack.c.bf16 %v423_v38, %v419_v37  ;;  %v427_v43 = vld [vmem:[#allocation3 + $0x310] sm:$0xff] }
  0xa3   :  { %1512 = vmatprep.subr.bf16.mxu0 %v3045_v47  ;;  %1898 = vmatprep.subr.bf16.mxu1 %v3048_v48  ;;  %v347_v47 = vld [vmem:[#allocation3 + $0x90] sm:$0xff] }
  0xa4   :  { %v351_v48 = vld [vmem:[#allocation3 + $0xb0] sm:$0xff] }
  0xa5   :  { %v467_v51 = vpack.c.bf16 %v351_v48, %v347_v47  ;;  %v431_v44 = vld [vmem:[#allocation3 + $0x330] sm:$0xff] }
  0xa6   :  { %1513 = vmatpush1.bf16.msra.mxu0 %v3043_v53  ;;  %1899 = vmatpush1.bf16.msra.mxu1 %v3046_v54  ;;  %v355_v53 = vld [vmem:[#allocation3 + $0xd0] sm:$0xff]  ;;  %v507_v47 = vpack.c.bf16 %v431_v44, %v427_v43 }
  0xa7   :  { %v359_v54 = vld [vmem:[#allocation3 + $0xf0] sm:$0xff] }
  0xa8   :  { %1402 = vmatmul.mubr.bf16.gmra.mrb[32].mxu0 %v489_v55  ;;  %1788 = vmatmul.mubr.bf16.gmra.mrb[32].mxu1 %v489_v55  ;;  %v364_v55 = vld [vmem:[#allocation3 + $0x118] sm:$0xff]  ;;  %v471_v57 = vpack.c.bf16 %v359_v54, %v355_v53  ;;  %v511_v53 = vpack.c.bf16 %v439_v50, %v435_v49 }
  0xa9   :  { %1411 = vmatprep.mubr.bf16.mxu0 %v494_v56  ;;  %1797 = vmatprep.mubr.bf16.mxu1 %v494_v56  ;;  %v368_v56 = vld [vmem:[#allocation3 + $0x138] sm:$0xff] }
  0xaa   :  { %v476_v58 = vpack.c.bf16 %v368_v56, %v364_v55  ;;  %v443_v55 = vld [vmem:[#allocation3 + $0x390] sm:$0xff] }
  0xab   :  { %v447_v56 = vld [vmem:[#allocation3 + $0x3b0] sm:$0xff] }
  0xac   :  { %v515_v59 = vpack.c.bf16 %v447_v56, %v443_v55 }
  0xb0   :  { %1412 = vmatmul.mubr.bf16.gmra.mrb[36].mxu0 %v493_v61  ;;  %1798 = vmatmul.mubr.bf16.gmra.mrb[36].mxu1 %v493_v61  ;;  %v372_v61 = vld [vmem:[#allocation3 + $0x158] sm:$0xff] }
  0xb1   :  { %1421 = vmatprep.mubr.bf16.mxu0 %v498_v62  ;;  %1807 = vmatprep.mubr.bf16.mxu1 %v498_v62  ;;  %v376_v62 = vld [vmem:[#allocation3 + $0x178] sm:$0xff] }
  0xb2   :  { %v480_v0 = vpack.c.bf16 %v376_v62, %v372_v61  ;;  %v451_v61 = vld [vmem:[#allocation3 + $0x3d0] sm:$0xff] }
  0xb3   :  { %v455_v62 = vld [vmem:[#allocation3 + $0x3f0] sm:$0xff] }
  0xb8   :  { %1422 = vmatmul.mubr.bf16.gmra.mrb[40].mxu0 %v497_v3  ;;  %1808 = vmatmul.mubr.bf16.gmra.mrb[40].mxu1 %v497_v3  ;;  %v380_v3 = vld [vmem:[#allocation3 + $0x198] sm:$0xff] }
  0xb9   :  { %1431 = vmatprep.mubr.bf16.mxu0 %v502_v4  ;;  %1817 = vmatprep.mubr.bf16.mxu1 %v502_v4  ;;  %v384_v4 = vld [vmem:[#allocation3 + $0x1b8] sm:$0xff] }
  0xba   :  { %v484_v6 = vpack.c.bf16 %v384_v4, %v380_v3  ;;  %v47_v4 = vld [vmem:[%s3331_s2] sm:$0xf]  ;;  %s3127_s2 = smov [#allocation8]  }
  0xbb   :  { %s2581_s13 = sshll.u32 %s3127_s2, 4  ;;  %s2582_s13 = int_to_ptr.vmem [resolvable:$true] %s2581_s13 }
  0xbc   :  { %s3093_s14 = scalar_lea.vmem %s2582_s13, 16384  ;;  %p3098_p3 = scmp.lt.s32.totalorder %s2582_s13, %s2582_s13 }
  0xbd   :  { %p3094_p2 = scmp.ne.s32.totalorder %s2582_s13, %s3093_s14  ;;  %p3099_p4 = scmp.lt.s32.totalorder %s3093_s14, %s3093_s14 }
  0xbf   :  { %p3100_p5 = por %p3099_p4, %p3098_p3 }
  0xc0   :  { %1432 = vmatmul.mubr.bf16.gmra.mrb[44].mxu0 %v501_v9  ;;  %1818 = vmatmul.mubr.bf16.gmra.mrb[44].mxu1 %v501_v9  ;;  %v388_v9 = vld [vmem:[#allocation3 + $0x1d8] sm:$0xff] }
  0xc1   :  { %1441 = vmatprep.mubr.bf16.mxu0 %v506_v10  ;;  %1827 = vmatprep.mubr.bf16.mxu1 %v506_v10  ;;  %v392_v10 = vld [vmem:[#allocation3 + $0x1f8] sm:$0xff]  ;;  %p3101_p6 = pnand %p3100_p5, %p3094_p2 }
  0xc2   :  { %v488_v12 = vpack.c.bf16 %v392_v10, %v388_v9 }
  0xc8   :  { %1442 = vmatmul.mubr.bf16.gmra.mrb[48].mxu0 %v505_v15  ;;  %1828 = vmatmul.mubr.bf16.gmra.mrb[48].mxu1 %v505_v15  ;;  %v396_v15 = vld [vmem:[#allocation3 + $0x218] sm:$0xff] }
  0xc9   :  { %1451 = vmatprep.mubr.bf16.mxu0 %v510_v16  ;;  %1837 = vmatprep.mubr.bf16.mxu1 %v510_v16  ;;  %v400_v16 = vld [vmem:[#allocation3 + $0x238] sm:$0xff] }
  0xca   :  { %v492_v18 = vpack.c.bf16 %v400_v16, %v396_v15 }
  0xd0   :  { %1452 = vmatmul.mubr.bf16.gmra.mrb[52].mxu0 %v509_v21  ;;  %1838 = vmatmul.mubr.bf16.gmra.mrb[52].mxu1 %v509_v21  ;;  %v404_v21 = vld [vmem:[#allocation3 + $0x258] sm:$0xff] }
  0xd1   :  { %1461 = vmatprep.mubr.bf16.mxu0 %v514_v22  ;;  %1847 = vmatprep.mubr.bf16.mxu1 %v514_v22  ;;  %v408_v22 = vld [vmem:[#allocation3 + $0x278] sm:$0xff] }
  0xd2   :  { %v496_v24 = vpack.c.bf16 %v408_v22, %v404_v21 }
  0xd8   :  { %1462 = vmatmul.mubr.bf16.gmra.mrb[56].mxu0 %v513_v27  ;;  %1848 = vmatmul.mubr.bf16.gmra.mrb[56].mxu1 %v513_v27  ;;  %v412_v27 = vld [vmem:[#allocation3 + $0x298] sm:$0xff] }
  0xd9   :  { %1471 = vmatprep.mubr.bf16.mxu0 %v518_v28  ;;  %1857 = vmatprep.mubr.bf16.mxu1 %v518_v28  ;;  %v416_v28 = vld [vmem:[#allocation3 + $0x2b8] sm:$0xff] }
  0xda   :  { %v500_v30 = vpack.c.bf16 %v416_v28, %v412_v27 }
  0xe0   :  { %1472 = vmatmul.mubr.bf16.gmra.mrb[60].mxu0 %v517_v33  ;;  %1858 = vmatmul.mubr.bf16.gmra.mrb[60].mxu1 %v517_v33  ;;  %v420_v33 = vld [vmem:[#allocation3 + $0x2d8] sm:$0xff] }
  0xe1   :  { %1514 = vmatprep.mubr.bf16.mxu0 %v460_v34  ;;  %1900 = vmatprep.mubr.bf16.mxu1 %v460_v34  ;;  %v424_v34 = vld [vmem:[#allocation3 + $0x2f8] sm:$0xff] }
  0xe2   :  { %v504_v36 = vpack.c.bf16 %v424_v34, %v420_v33 }
  0xe8   :  { %1515 = vmatmul.mubr.bf16.vlgmr.msra.gmra.mrb[0].mxu0 %v459_v39  ;;  %1901 = vmatmul.mubr.bf16.vlgmr.msra.gmra.mrb[0].mxu1 %v459_v39  ;;  %v428_v39 = vld [vmem:[#allocation3 + $0x318] sm:$0xff] }
  0xe9   :  { %1524 = vmatprep.mubr.bf16.mxu0 %v464_v40  ;;  %1910 = vmatprep.mubr.bf16.mxu1 %v464_v40  ;;  %v432_v40 = vld [vmem:[#allocation3 + $0x338] sm:$0xff] }
  0xea   :  { %v508_v42 = vpack.c.bf16 %v432_v40, %v428_v39 }
  0xf0   :  { %1525 = vmatmul.mubr.bf16.gmra.mrb[4].mxu0 %v463_v45  ;;  %1911 = vmatmul.mubr.bf16.gmra.mrb[4].mxu1 %v463_v45  ;;  %v436_v45 = vld [vmem:[#allocation3 + $0x358] sm:$0xff] }
  0xf1   :  { %1534 = vmatprep.mubr.bf16.mxu0 %v468_v46  ;;  %1920 = vmatprep.mubr.bf16.mxu1 %v468_v46  ;;  %v440_v46 = vld [vmem:[#allocation3 + $0x378] sm:$0xff] }
  0xf2   :  { %v512_v48 = vpack.c.bf16 %v440_v46, %v436_v45 }
  0xf8   :  { %1535 = vmatmul.mubr.bf16.gmra.mrb[8].mxu0 %v467_v51  ;;  %1921 = vmatmul.mubr.bf16.gmra.mrb[8].mxu1 %v467_v51  ;;  %v444_v51 = vld [vmem:[#allocation3 + $0x398] sm:$0xff] }
  0xf9   :  { %1544 = vmatprep.mubr.bf16.mxu0 %v472_v52  ;;  %1930 = vmatprep.mubr.bf16.mxu1 %v472_v52  ;;  %v448_v52 = vld [vmem:[#allocation3 + $0x3b8] sm:$0xff] }
  0xfa   :  { %v516_v54 = vpack.c.bf16 %v448_v52, %v444_v51 }
 0x100   :  { %1545 = vmatmul.mubr.bf16.gmra.mrb[12].mxu0 %v471_v57  ;;  %1931 = vmatmul.mubr.bf16.gmra.mrb[12].mxu1 %v471_v57  ;;  %v452_v57 = vld [vmem:[#allocation3 + $0x3d8] sm:$0xff] }
 0x101   :  { %1554 = vmatprep.mubr.bf16.mxu0 %v476_v58  ;;  %1940 = vmatprep.mubr.bf16.mxu1 %v476_v58  ;;  %v456_v58 = vld [vmem:[#allocation3 + $0x3f8] sm:$0xff] }
 0x102   :  { %v520_v60 = vpack.c.bf16 %v456_v58, %v452_v57 }
 0x108   :  { %1555 = vmatmul.mubr.bf16.gmra.mrb[16].mxu0 %v475_v63  ;;  %1941 = vmatmul.mubr.bf16.gmra.mrb[16].mxu1 %v475_v63  ;;  %v519_v63 = vpack.c.bf16 %v455_v62, %v451_v61 }
 0x109   :  { %1564 = vmatprep.mubr.bf16.mxu0 %v480_v0  ;;  %1950 = vmatprep.mubr.bf16.mxu1 %v480_v0  ;;  %v49_v0 = vlaneseq }
 0x10b   :  { %v50_v1 = vshrl.u32 %v49_v0, 7 }
 0x10d   :  { %v51_v2 = vsub.s32 0, %v50_v1  ;;  %v59_v3 = vsub.s32 2, %v50_v1 }
 0x10f   :  { %v3178_v7 = vrot.slane %v47_v4, %v51_v2  ;;  %v3180_v8 = vrot.slane %v47_v4, %v59_v3 }
 0x110   :  { %1565 = vmatmul.mubr.bf16.gmra.mrb[20].mxu0 %v479_v5  ;;  %1951 = vmatmul.mubr.bf16.gmra.mrb[20].mxu1 %v479_v5  ;;  %v55_v5 = vsub.s32 1, %v50_v1 }
 0x111   :  { %1574 = vmatprep.mubr.bf16.mxu0 %v484_v6  ;;  %1960 = vmatprep.mubr.bf16.mxu1 %v484_v6  ;;  %v63_v6 = vsub.s32 3, %v50_v1 }
 0x112   :  { %v3182_v9 = vrot.slane %v47_v4, %v55_v5 }
 0x113   :  { %v3184_v10 = vrot.slane %v47_v4, %v63_v6 }
 0x118   :  { %1575 = vmatmul.mubr.bf16.gmra.mrb[24].mxu0 %v483_v11  ;;  %1961 = vmatmul.mubr.bf16.gmra.mrb[24].mxu1 %v483_v11 }
 0x119   :  { %1584 = vmatprep.mubr.bf16.mxu0 %v488_v12  ;;  %1970 = vmatprep.mubr.bf16.mxu1 %v488_v12 }
 0x120   :  { %1585 = vmatmul.mubr.bf16.gmra.mrb[28].mxu0 %v487_v17  ;;  %1971 = vmatmul.mubr.bf16.gmra.mrb[28].mxu1 %v487_v17 }
 0x121   :  { %1594 = vmatprep.mubr.bf16.mxu0 %v492_v18  ;;  %1980 = vmatprep.mubr.bf16.mxu1 %v492_v18 }
 0x128   :  { %1595 = vmatmul.mubr.bf16.gmra.mrb[32].mxu0 %v491_v23  ;;  %1981 = vmatmul.mubr.bf16.gmra.mrb[32].mxu1 %v491_v23 }
 0x129   :  { %1604 = vmatprep.mubr.bf16.mxu0 %v496_v24  ;;  %1990 = vmatprep.mubr.bf16.mxu1 %v496_v24 }
 0x130   :  { %1605 = vmatmul.mubr.bf16.gmra.mrb[36].mxu0 %v495_v29  ;;  %1991 = vmatmul.mubr.bf16.gmra.mrb[36].mxu1 %v495_v29 }
 0x131   :  { %1614 = vmatprep.mubr.bf16.mxu0 %v500_v30  ;;  %2000 = vmatprep.mubr.bf16.mxu1 %v500_v30 }
 0x138   :  { %1615 = vmatmul.mubr.bf16.gmra.mrb[40].mxu0 %v499_v35  ;;  %2001 = vmatmul.mubr.bf16.gmra.mrb[40].mxu1 %v499_v35 }
 0x139   :  { %1624 = vmatprep.mubr.bf16.mxu0 %v504_v36  ;;  %2010 = vmatprep.mubr.bf16.mxu1 %v504_v36 }
 0x140   :  { %1625 = vmatmul.mubr.bf16.gmra.mrb[44].mxu0 %v503_v41  ;;  %2011 = vmatmul.mubr.bf16.gmra.mrb[44].mxu1 %v503_v41 }
 0x141   :  { %1634 = vmatprep.mubr.bf16.mxu0 %v508_v42  ;;  %2020 = vmatprep.mubr.bf16.mxu1 %v508_v42 }
 0x148   :  { %1635 = vmatmul.mubr.bf16.gmra.mrb[48].mxu0 %v507_v47  ;;  %2021 = vmatmul.mubr.bf16.gmra.mrb[48].mxu1 %v507_v47 }
 0x149   :  { %1644 = vmatprep.mubr.bf16.mxu0 %v512_v48  ;;  %2030 = vmatprep.mubr.bf16.mxu1 %v512_v48 }
 0x150   :  { %1645 = vmatmul.mubr.bf16.gmra.mrb[52].mxu0 %v511_v53  ;;  %2031 = vmatmul.mubr.bf16.gmra.mrb[52].mxu1 %v511_v53 }
 0x151   :  { %1654 = vmatprep.mubr.bf16.mxu0 %v516_v54  ;;  %2040 = vmatprep.mubr.bf16.mxu1 %v516_v54 }
 0x158   :  { %1655 = vmatmul.mubr.bf16.gmra.mrb[56].mxu0 %v515_v59  ;;  %2041 = vmatmul.mubr.bf16.gmra.mrb[56].mxu1 %v515_v59 }
 0x159   :  { %1664 = vmatprep.mubr.bf16.mxu0 %v520_v60  ;;  %2050 = vmatprep.mubr.bf16.mxu1 %v520_v60 }
 0x160   :  { %1665 = vmatmul.mubr.bf16.gmra.mrb[60].mxu0 %v519_v63  ;;  %2051 = vmatmul.mubr.bf16.gmra.mrb[60].mxu1 %v519_v63 }
 0x1bb   :  { %v1516_v11 = vpop.f32.mrb[0].mxu0  ;;  %v1902_v12 = vpop.f32.mrb[0].mxu1 }
 0x1bc   :  { %v2061_v13 = vadd.f32 %v1516_v11, %v3178_v7  ;;  %v2063_v14 = vadd.f32 %v1902_v12, %v3180_v8  ;;  %v1518_v15 = vpop.f32.mrb[1].mxu0  ;;  %v1904_v16 = vpop.f32.mrb[1].mxu1 }
 0x1bd   :  { %v2062_v17 = vadd.f32 %v1518_v15, %v3182_v9  ;;  %v2064_v18 = vadd.f32 %v1904_v16, %v3184_v10  ;;  %v1520_v19 = vpop.f32.mrb[2].mxu0  ;;  %v1906_v20 = vpop.f32.mrb[2].mxu1 }
 0x1be   :  { %2448 = vst [vmem:[#allocation8] sm:$0xff] %v2061_v13  ;;  %2450 = vst [vmem:[#allocation8 + $0x10] sm:$0xff] %v2063_v14  ;;  %v2065_v21 = vadd.f32 %v1520_v19, %v3178_v7  ;;  %v2067_v22 = vadd.f32 %v1906_v20, %v3180_v8  ;;  %v1522_v23 = vpop.f32.mrb[3].mxu0  ;;  %v1908_v24 = vpop.f32.mrb[3].mxu1 }
 0x1bf   :  { %2449 = vst [vmem:[#allocation8 + $0x8] sm:$0xff] %v2062_v17  ;;  %2451 = vst [vmem:[#allocation8 + $0x18] sm:$0xff] %v2064_v18  ;;  %v2066_v25 = vadd.f32 %v1522_v23, %v3182_v9  ;;  %v2068_v26 = vadd.f32 %v1908_v24, %v3184_v10 }
 0x1c0   :  { %2452 = vst [vmem:[#allocation8 + $0x20] sm:$0xff] %v2065_v21  ;;  %2454 = vst [vmem:[#allocation8 + $0x30] sm:$0xff] %v2067_v22 }
 0x1c1   :  { %2453 = vst [vmem:[#allocation8 + $0x28] sm:$0xff] %v2066_v25  ;;  %2455 = vst [vmem:[#allocation8 + $0x38] sm:$0xff] %v2068_v26 }
 0x1c3   :  { %v1526_v27 = vpop.f32.mrb[4].mxu0  ;;  %v1912_v28 = vpop.f32.mrb[4].mxu1 }
 0x1c4   :  { %v2069_v29 = vadd.f32 %v1526_v27, %v3178_v7  ;;  %v2071_v30 = vadd.f32 %v1912_v28, %v3180_v8  ;;  %v1528_v31 = vpop.f32.mrb[5].mxu0  ;;  %v1914_v32 = vpop.f32.mrb[5].mxu1 }
 0x1c5   :  { %v2070_v33 = vadd.f32 %v1528_v31, %v3182_v9  ;;  %v2072_v34 = vadd.f32 %v1914_v32, %v3184_v10  ;;  %v1530_v35 = vpop.f32.mrb[6].mxu0  ;;  %v1916_v36 = vpop.f32.mrb[6].mxu1 }
 0x1c6   :  { %2456 = vst [vmem:[#allocation8 + $0x40] sm:$0xff] %v2069_v29  ;;  %2458 = vst [vmem:[#allocation8 + $0x50] sm:$0xff] %v2071_v30  ;;  %v2073_v37 = vadd.f32 %v1530_v35, %v3178_v7  ;;  %v2075_v38 = vadd.f32 %v1916_v36, %v3180_v8  ;;  %v1532_v39 = vpop.f32.mrb[7].mxu0  ;;  %v1918_v40 = vpop.f32.mrb[7].mxu1 }
 0x1c7   :  { %2457 = vst [vmem:[#allocation8 + $0x48] sm:$0xff] %v2070_v33  ;;  %2459 = vst [vmem:[#allocation8 + $0x58] sm:$0xff] %v2072_v34  ;;  %v2074_v41 = vadd.f32 %v1532_v39, %v3182_v9  ;;  %v2076_v42 = vadd.f32 %v1918_v40, %v3184_v10 }
 0x1c8   :  { %2460 = vst [vmem:[#allocation8 + $0x60] sm:$0xff] %v2073_v37  ;;  %2462 = vst [vmem:[#allocation8 + $0x70] sm:$0xff] %v2075_v38 }
 0x1c9   :  { %2461 = vst [vmem:[#allocation8 + $0x68] sm:$0xff] %v2074_v41  ;;  %2463 = vst [vmem:[#allocation8 + $0x78] sm:$0xff] %v2076_v42 }
 0x1cb   :  { %v1536_v43 = vpop.f32.mrb[8].mxu0  ;;  %v1922_v44 = vpop.f32.mrb[8].mxu1 }
 0x1cc   :  { %v2077_v45 = vadd.f32 %v1536_v43, %v3178_v7  ;;  %v2079_v46 = vadd.f32 %v1922_v44, %v3180_v8  ;;  %v1538_v47 = vpop.f32.mrb[9].mxu0  ;;  %v1924_v48 = vpop.f32.mrb[9].mxu1 }
 0x1cd   :  { %v2078_v49 = vadd.f32 %v1538_v47, %v3182_v9  ;;  %v2080_v50 = vadd.f32 %v1924_v48, %v3184_v10  ;;  %v1540_v51 = vpop.f32.mrb[10].mxu0  ;;  %v1926_v52 = vpop.f32.mrb[10].mxu1 }
 0x1ce   :  { %2464 = vst [vmem:[#allocation8 + $0x80] sm:$0xff] %v2077_v45  ;;  %2466 = vst [vmem:[#allocation8 + $0x90] sm:$0xff] %v2079_v46  ;;  %v2081_v53 = vadd.f32 %v1540_v51, %v3178_v7  ;;  %v2083_v54 = vadd.f32 %v1926_v52, %v3180_v8  ;;  %v1542_v55 = vpop.f32.mrb[11].mxu0  ;;  %v1928_v56 = vpop.f32.mrb[11].mxu1 }
 0x1cf   :  { %2465 = vst [vmem:[#allocation8 + $0x88] sm:$0xff] %v2078_v49  ;;  %2467 = vst [vmem:[#allocation8 + $0x98] sm:$0xff] %v2080_v50  ;;  %v2082_v57 = vadd.f32 %v1542_v55, %v3182_v9  ;;  %v2084_v58 = vadd.f32 %v1928_v56, %v3184_v10 }
 0x1d0   :  { %2468 = vst [vmem:[#allocation8 + $0xa0] sm:$0xff] %v2081_v53  ;;  %2470 = vst [vmem:[#allocation8 + $0xb0] sm:$0xff] %v2083_v54 }
 0x1d1   :  { %2469 = vst [vmem:[#allocation8 + $0xa8] sm:$0xff] %v2082_v57  ;;  %2471 = vst [vmem:[#allocation8 + $0xb8] sm:$0xff] %v2084_v58 }
 0x1d3   :  { %v1546_v59 = vpop.f32.mrb[12].mxu0  ;;  %v1932_v60 = vpop.f32.mrb[12].mxu1 }
 0x1d4   :  { %v2085_v61 = vadd.f32 %v1546_v59, %v3178_v7  ;;  %v2087_v62 = vadd.f32 %v1932_v60, %v3180_v8  ;;  %v1548_v63 = vpop.f32.mrb[13].mxu0  ;;  %v1934_v0 = vpop.f32.mrb[13].mxu1 }
 0x1d5   :  { %v2086_v1 = vadd.f32 %v1548_v63, %v3182_v9  ;;  %v2088_v2 = vadd.f32 %v1934_v0, %v3184_v10  ;;  %v1550_v3 = vpop.f32.mrb[14].mxu0  ;;  %v1936_v4 = vpop.f32.mrb[14].mxu1 }
 0x1d6   :  { %2472 = vst [vmem:[#allocation8 + $0xc0] sm:$0xff] %v2085_v61  ;;  %2474 = vst [vmem:[#allocation8 + $0xd0] sm:$0xff] %v2087_v62  ;;  %v2089_v5 = vadd.f32 %v1550_v3, %v3178_v7  ;;  %v2091_v6 = vadd.f32 %v1936_v4, %v3180_v8  ;;  %v1552_v11 = vpop.f32.mrb[15].mxu0  ;;  %v1938_v12 = vpop.f32.mrb[15].mxu1 }
 0x1d7   :  { %2473 = vst [vmem:[#allocation8 + $0xc8] sm:$0xff] %v2086_v1  ;;  %2475 = vst [vmem:[#allocation8 + $0xd8] sm:$0xff] %v2088_v2  ;;  %v2090_v13 = vadd.f32 %v1552_v11, %v3182_v9  ;;  %v2092_v14 = vadd.f32 %v1938_v12, %v3184_v10 }
 0x1d8   :  { %2476 = vst [vmem:[#allocation8 + $0xe0] sm:$0xff] %v2089_v5  ;;  %2478 = vst [vmem:[#allocation8 + $0xf0] sm:$0xff] %v2091_v6 }
 0x1d9   :  { %2477 = vst [vmem:[#allocation8 + $0xe8] sm:$0xff] %v2090_v13  ;;  %2479 = vst [vmem:[#allocation8 + $0xf8] sm:$0xff] %v2092_v14 }
 0x1db   :  { %v1556_v15 = vpop.f32.mrb[16].mxu0  ;;  %v1942_v16 = vpop.f32.mrb[16].mxu1 }
 0x1dc   :  { %v2093_v17 = vadd.f32 %v1556_v15, %v3178_v7  ;;  %v2095_v18 = vadd.f32 %v1942_v16, %v3180_v8  ;;  %v1558_v19 = vpop.f32.mrb[17].mxu0  ;;  %v1944_v20 = vpop.f32.mrb[17].mxu1 }
 0x1dd   :  { %v2094_v21 = vadd.f32 %v1558_v19, %v3182_v9  ;;  %v2096_v22 = vadd.f32 %v1944_v20, %v3184_v10  ;;  %v1560_v23 = vpop.f32.mrb[18].mxu0  ;;  %v1946_v24 = vpop.f32.mrb[18].mxu1 }
 0x1de   :  { %2480 = vst [vmem:[#allocation8 + $0x100] sm:$0xff] %v2093_v17  ;;  %2482 = vst [vmem:[#allocation8 + $0x110] sm:$0xff] %v2095_v18  ;;  %v2097_v25 = vadd.f32 %v1560_v23, %v3178_v7  ;;  %v2099_v26 = vadd.f32 %v1946_v24, %v3180_v8  ;;  %v1562_v27 = vpop.f32.mrb[19].mxu0  ;;  %v1948_v28 = vpop.f32.mrb[19].mxu1 }
 0x1df   :  { %2481 = vst [vmem:[#allocation8 + $0x108] sm:$0xff] %v2094_v21  ;;  %2483 = vst [vmem:[#allocation8 + $0x118] sm:$0xff] %v2096_v22  ;;  %v2098_v29 = vadd.f32 %v1562_v27, %v3182_v9  ;;  %v2100_v30 = vadd.f32 %v1948_v28, %v3184_v10 }
 0x1e0   :  { %2484 = vst [vmem:[#allocation8 + $0x120] sm:$0xff] %v2097_v25  ;;  %2486 = vst [vmem:[#allocation8 + $0x130] sm:$0xff] %v2099_v26 }
 0x1e1   :  { %2485 = vst [vmem:[#allocation8 + $0x128] sm:$0xff] %v2098_v29  ;;  %2487 = vst [vmem:[#allocation8 + $0x138] sm:$0xff] %v2100_v30 }
 0x1e3   :  { %v1566_v31 = vpop.f32.mrb[20].mxu0  ;;  %v1952_v32 = vpop.f32.mrb[20].mxu1 }
 0x1e4   :  { %v2101_v33 = vadd.f32 %v1566_v31, %v3178_v7  ;;  %v2103_v34 = vadd.f32 %v1952_v32, %v3180_v8  ;;  %v1568_v35 = vpop.f32.mrb[21].mxu0  ;;  %v1954_v36 = vpop.f32.mrb[21].mxu1 }
 0x1e5   :  { %v2102_v37 = vadd.f32 %v1568_v35, %v3182_v9  ;;  %v2104_v38 = vadd.f32 %v1954_v36, %v3184_v10  ;;  %v1570_v39 = vpop.f32.mrb[22].mxu0  ;;  %v1956_v40 = vpop.f32.mrb[22].mxu1 }
 0x1e6   :  { %2488 = vst [vmem:[#allocation8 + $0x140] sm:$0xff] %v2101_v33  ;;  %2490 = vst [vmem:[#allocation8 + $0x150] sm:$0xff] %v2103_v34  ;;  %v2105_v41 = vadd.f32 %v1570_v39, %v3178_v7  ;;  %v2107_v42 = vadd.f32 %v1956_v40, %v3180_v8  ;;  %v1572_v43 = vpop.f32.mrb[23].mxu0  ;;  %v1958_v44 = vpop.f32.mrb[23].mxu1 }
 0x1e7   :  { %2489 = vst [vmem:[#allocation8 + $0x148] sm:$0xff] %v2102_v37  ;;  %2491 = vst [vmem:[#allocation8 + $0x158] sm:$0xff] %v2104_v38  ;;  %v2106_v45 = vadd.f32 %v1572_v43, %v3182_v9  ;;  %v2108_v46 = vadd.f32 %v1958_v44, %v3184_v10 }
 0x1e8   :  { %2492 = vst [vmem:[#allocation8 + $0x160] sm:$0xff] %v2105_v41  ;;  %2494 = vst [vmem:[#allocation8 + $0x170] sm:$0xff] %v2107_v42 }
 0x1e9   :  { %2493 = vst [vmem:[#allocation8 + $0x168] sm:$0xff] %v2106_v45  ;;  %2495 = vst [vmem:[#allocation8 + $0x178] sm:$0xff] %v2108_v46 }
 0x1eb   :  { %v1576_v47 = vpop.f32.mrb[24].mxu0  ;;  %v1962_v48 = vpop.f32.mrb[24].mxu1 }
 0x1ec   :  { %v2109_v49 = vadd.f32 %v1576_v47, %v3178_v7  ;;  %v2111_v50 = vadd.f32 %v1962_v48, %v3180_v8  ;;  %v1578_v51 = vpop.f32.mrb[25].mxu0  ;;  %v1964_v52 = vpop.f32.mrb[25].mxu1 }
 0x1ed   :  { %v2110_v53 = vadd.f32 %v1578_v51, %v3182_v9  ;;  %v2112_v54 = vadd.f32 %v1964_v52, %v3184_v10  ;;  %v1580_v55 = vpop.f32.mrb[26].mxu0  ;;  %v1966_v56 = vpop.f32.mrb[26].mxu1 }
 0x1ee   :  { %2496 = vst [vmem:[#allocation8 + $0x180] sm:$0xff] %v2109_v49  ;;  %2498 = vst [vmem:[#allocation8 + $0x190] sm:$0xff] %v2111_v50  ;;  %v2113_v57 = vadd.f32 %v1580_v55, %v3178_v7  ;;  %v2115_v58 = vadd.f32 %v1966_v56, %v3180_v8  ;;  %v1582_v59 = vpop.f32.mrb[27].mxu0  ;;  %v1968_v60 = vpop.f32.mrb[27].mxu1 }
 0x1ef   :  { %2497 = vst [vmem:[#allocation8 + $0x188] sm:$0xff] %v2110_v53  ;;  %2499 = vst [vmem:[#allocation8 + $0x198] sm:$0xff] %v2112_v54  ;;  %v2114_v61 = vadd.f32 %v1582_v59, %v3182_v9  ;;  %v2116_v62 = vadd.f32 %v1968_v60, %v3184_v10 }
 0x1f0   :  { %2500 = vst [vmem:[#allocation8 + $0x1a0] sm:$0xff] %v2113_v57  ;;  %2502 = vst [vmem:[#allocation8 + $0x1b0] sm:$0xff] %v2115_v58 }
 0x1f1   :  { %2501 = vst [vmem:[#allocation8 + $0x1a8] sm:$0xff] %v2114_v61  ;;  %2503 = vst [vmem:[#allocation8 + $0x1b8] sm:$0xff] %v2116_v62 }
 0x1f3   :  { %v1586_v63 = vpop.f32.mrb[28].mxu0  ;;  %v1972_v0 = vpop.f32.mrb[28].mxu1 }
 0x1f4   :  { %v2117_v1 = vadd.f32 %v1586_v63, %v3178_v7  ;;  %v2119_v2 = vadd.f32 %v1972_v0, %v3180_v8  ;;  %v1588_v3 = vpop.f32.mrb[29].mxu0  ;;  %v1974_v4 = vpop.f32.mrb[29].mxu1 }
 0x1f5   :  { %v2118_v5 = vadd.f32 %v1588_v3, %v3182_v9  ;;  %v2120_v6 = vadd.f32 %v1974_v4, %v3184_v10  ;;  %v1590_v11 = vpop.f32.mrb[30].mxu0  ;;  %v1976_v12 = vpop.f32.mrb[30].mxu1 }
 0x1f6   :  { %2504 = vst [vmem:[#allocation8 + $0x1c0] sm:$0xff] %v2117_v1  ;;  %2506 = vst [vmem:[#allocation8 + $0x1d0] sm:$0xff] %v2119_v2  ;;  %v2121_v13 = vadd.f32 %v1590_v11, %v3178_v7  ;;  %v2123_v14 = vadd.f32 %v1976_v12, %v3180_v8  ;;  %v1592_v15 = vpop.f32.mrb[31].mxu0  ;;  %v1978_v16 = vpop.f32.mrb[31].mxu1 }
 0x1f7   :  { %2505 = vst [vmem:[#allocation8 + $0x1c8] sm:$0xff] %v2118_v5  ;;  %2507 = vst [vmem:[#allocation8 + $0x1d8] sm:$0xff] %v2120_v6  ;;  %v2122_v17 = vadd.f32 %v1592_v15, %v3182_v9  ;;  %v2124_v18 = vadd.f32 %v1978_v16, %v3184_v10 }
 0x1f8   :  { %2508 = vst [vmem:[#allocation8 + $0x1e0] sm:$0xff] %v2121_v13  ;;  %2510 = vst [vmem:[#allocation8 + $0x1f0] sm:$0xff] %v2123_v14 }
 0x1f9   :  { %2509 = vst [vmem:[#allocation8 + $0x1e8] sm:$0xff] %v2122_v17  ;;  %2511 = vst [vmem:[#allocation8 + $0x1f8] sm:$0xff] %v2124_v18 }
 0x1fb   :  { %v1596_v19 = vpop.f32.mrb[32].mxu0  ;;  %v1982_v20 = vpop.f32.mrb[32].mxu1 }
 0x1fc   :  { %v2125_v21 = vadd.f32 %v1596_v19, %v3178_v7  ;;  %v2127_v22 = vadd.f32 %v1982_v20, %v3180_v8  ;;  %v1598_v23 = vpop.f32.mrb[33].mxu0  ;;  %v1984_v24 = vpop.f32.mrb[33].mxu1 }
 0x1fd   :  { %v2126_v25 = vadd.f32 %v1598_v23, %v3182_v9  ;;  %v2128_v26 = vadd.f32 %v1984_v24, %v3184_v10  ;;  %v1600_v27 = vpop.f32.mrb[34].mxu0  ;;  %v1986_v28 = vpop.f32.mrb[34].mxu1 }
 0x1fe   :  { %2512 = vst [vmem:[#allocation8 + $0x200] sm:$0xff] %v2125_v21  ;;  %2514 = vst [vmem:[#allocation8 + $0x210] sm:$0xff] %v2127_v22  ;;  %v2129_v29 = vadd.f32 %v1600_v27, %v3178_v7  ;;  %v2131_v30 = vadd.f32 %v1986_v28, %v3180_v8  ;;  %v1602_v31 = vpop.f32.mrb[35].mxu0  ;;  %v1988_v32 = vpop.f32.mrb[35].mxu1 }
 0x1ff   :  { %2513 = vst [vmem:[#allocation8 + $0x208] sm:$0xff] %v2126_v25  ;;  %2515 = vst [vmem:[#allocation8 + $0x218] sm:$0xff] %v2128_v26  ;;  %v2130_v33 = vadd.f32 %v1602_v31, %v3182_v9  ;;  %v2132_v34 = vadd.f32 %v1988_v32, %v3184_v10 }
 0x200   :  { %2516 = vst [vmem:[#allocation8 + $0x220] sm:$0xff] %v2129_v29  ;;  %2518 = vst [vmem:[#allocation8 + $0x230] sm:$0xff] %v2131_v30 }
 0x201   :  { %2517 = vst [vmem:[#allocation8 + $0x228] sm:$0xff] %v2130_v33  ;;  %2519 = vst [vmem:[#allocation8 + $0x238] sm:$0xff] %v2132_v34 }
 0x203   :  { %v1606_v35 = vpop.f32.mrb[36].mxu0  ;;  %v1992_v36 = vpop.f32.mrb[36].mxu1 }
 0x204   :  { %v2133_v37 = vadd.f32 %v1606_v35, %v3178_v7  ;;  %v2135_v38 = vadd.f32 %v1992_v36, %v3180_v8  ;;  %v1608_v39 = vpop.f32.mrb[37].mxu0  ;;  %v1994_v40 = vpop.f32.mrb[37].mxu1 }
 0x205   :  { %v2134_v41 = vadd.f32 %v1608_v39, %v3182_v9  ;;  %v2136_v42 = vadd.f32 %v1994_v40, %v3184_v10  ;;  %v1610_v43 = vpop.f32.mrb[38].mxu0  ;;  %v1996_v44 = vpop.f32.mrb[38].mxu1 }
 0x206   :  { %2520 = vst [vmem:[#allocation8 + $0x240] sm:$0xff] %v2133_v37  ;;  %2522 = vst [vmem:[#allocation8 + $0x250] sm:$0xff] %v2135_v38  ;;  %v2137_v45 = vadd.f32 %v1610_v43, %v3178_v7  ;;  %v2139_v46 = vadd.f32 %v1996_v44, %v3180_v8  ;;  %v1612_v47 = vpop.f32.mrb[39].mxu0  ;;  %v1998_v48 = vpop.f32.mrb[39].mxu1 }
 0x207   :  { %2521 = vst [vmem:[#allocation8 + $0x248] sm:$0xff] %v2134_v41  ;;  %2523 = vst [vmem:[#allocation8 + $0x258] sm:$0xff] %v2136_v42  ;;  %v2138_v49 = vadd.f32 %v1612_v47, %v3182_v9  ;;  %v2140_v50 = vadd.f32 %v1998_v48, %v3184_v10 }
 0x208   :  { %2524 = vst [vmem:[#allocation8 + $0x260] sm:$0xff] %v2137_v45  ;;  %2526 = vst [vmem:[#allocation8 + $0x270] sm:$0xff] %v2139_v46 }
 0x209   :  { %2525 = vst [vmem:[#allocation8 + $0x268] sm:$0xff] %v2138_v49  ;;  %2527 = vst [vmem:[#allocation8 + $0x278] sm:$0xff] %v2140_v50 }
 0x20b   :  { %v1616_v51 = vpop.f32.mrb[40].mxu0  ;;  %v2002_v52 = vpop.f32.mrb[40].mxu1 }
 0x20c   :  { %v2141_v53 = vadd.f32 %v1616_v51, %v3178_v7  ;;  %v2143_v54 = vadd.f32 %v2002_v52, %v3180_v8  ;;  %v1618_v55 = vpop.f32.mrb[41].mxu0  ;;  %v2004_v56 = vpop.f32.mrb[41].mxu1 }
 0x20d   :  { %v2142_v57 = vadd.f32 %v1618_v55, %v3182_v9  ;;  %v2144_v58 = vadd.f32 %v2004_v56, %v3184_v10  ;;  %v1620_v59 = vpop.f32.mrb[42].mxu0  ;;  %v2006_v60 = vpop.f32.mrb[42].mxu1 }
 0x20e   :  { %2528 = vst [vmem:[#allocation8 + $0x280] sm:$0xff] %v2141_v53  ;;  %2530 = vst [vmem:[#allocation8 + $0x290] sm:$0xff] %v2143_v54  ;;  %v2145_v61 = vadd.f32 %v1620_v59, %v3178_v7  ;;  %v2147_v62 = vadd.f32 %v2006_v60, %v3180_v8  ;;  %v1622_v63 = vpop.f32.mrb[43].mxu0  ;;  %v2008_v0 = vpop.f32.mrb[43].mxu1 }
 0x20f   :  { %2529 = vst [vmem:[#allocation8 + $0x288] sm:$0xff] %v2142_v57  ;;  %2531 = vst [vmem:[#allocation8 + $0x298] sm:$0xff] %v2144_v58  ;;  %v2146_v1 = vadd.f32 %v1622_v63, %v3182_v9  ;;  %v2148_v2 = vadd.f32 %v2008_v0, %v3184_v10 }
 0x210   :  { %2532 = vst [vmem:[#allocation8 + $0x2a0] sm:$0xff] %v2145_v61  ;;  %2534 = vst [vmem:[#allocation8 + $0x2b0] sm:$0xff] %v2147_v62 }
 0x211   :  { %2533 = vst [vmem:[#allocation8 + $0x2a8] sm:$0xff] %v2146_v1  ;;  %2535 = vst [vmem:[#allocation8 + $0x2b8] sm:$0xff] %v2148_v2 }
 0x213   :  { %v1626_v3 = vpop.f32.mrb[44].mxu0  ;;  %v2012_v4 = vpop.f32.mrb[44].mxu1 }
 0x214   :  { %v2149_v5 = vadd.f32 %v1626_v3, %v3178_v7  ;;  %v2151_v6 = vadd.f32 %v2012_v4, %v3180_v8  ;;  %v1628_v11 = vpop.f32.mrb[45].mxu0  ;;  %v2014_v12 = vpop.f32.mrb[45].mxu1 }
 0x215   :  { %v2150_v13 = vadd.f32 %v1628_v11, %v3182_v9  ;;  %v2152_v14 = vadd.f32 %v2014_v12, %v3184_v10  ;;  %v1630_v15 = vpop.f32.mrb[46].mxu0  ;;  %v2016_v16 = vpop.f32.mrb[46].mxu1 }
 0x216   :  { %2536 = vst [vmem:[#allocation8 + $0x2c0] sm:$0xff] %v2149_v5  ;;  %2538 = vst [vmem:[#allocation8 + $0x2d0] sm:$0xff] %v2151_v6  ;;  %v2153_v17 = vadd.f32 %v1630_v15, %v3178_v7  ;;  %v2155_v18 = vadd.f32 %v2016_v16, %v3180_v8  ;;  %v1632_v19 = vpop.f32.mrb[47].mxu0  ;;  %v2018_v20 = vpop.f32.mrb[47].mxu1 }
 0x217   :  { %2537 = vst [vmem:[#allocation8 + $0x2c8] sm:$0xff] %v2150_v13  ;;  %2539 = vst [vmem:[#allocation8 + $0x2d8] sm:$0xff] %v2152_v14  ;;  %v2154_v21 = vadd.f32 %v1632_v19, %v3182_v9  ;;  %v2156_v22 = vadd.f32 %v2018_v20, %v3184_v10 }
 0x218   :  { %2540 = vst [vmem:[#allocation8 + $0x2e0] sm:$0xff] %v2153_v17  ;;  %2542 = vst [vmem:[#allocation8 + $0x2f0] sm:$0xff] %v2155_v18 }
 0x219   :  { %2541 = vst [vmem:[#allocation8 + $0x2e8] sm:$0xff] %v2154_v21  ;;  %2543 = vst [vmem:[#allocation8 + $0x2f8] sm:$0xff] %v2156_v22 }
 0x21b   :  { %v1636_v23 = vpop.f32.mrb[48].mxu0  ;;  %v2022_v24 = vpop.f32.mrb[48].mxu1 }
 0x21c   :  { %v2157_v25 = vadd.f32 %v1636_v23, %v3178_v7  ;;  %v2159_v26 = vadd.f32 %v2022_v24, %v3180_v8  ;;  %v1638_v27 = vpop.f32.mrb[49].mxu0  ;;  %v2024_v28 = vpop.f32.mrb[49].mxu1 }
 0x21d   :  { %v2158_v29 = vadd.f32 %v1638_v27, %v3182_v9  ;;  %v2160_v30 = vadd.f32 %v2024_v28, %v3184_v10  ;;  %v1640_v31 = vpop.f32.mrb[50].mxu0  ;;  %v2026_v32 = vpop.f32.mrb[50].mxu1 }
 0x21e   :  { %2544 = vst [vmem:[#allocation8 + $0x300] sm:$0xff] %v2157_v25  ;;  %2546 = vst [vmem:[#allocation8 + $0x310] sm:$0xff] %v2159_v26  ;;  %v2161_v33 = vadd.f32 %v1640_v31, %v3178_v7  ;;  %v2163_v34 = vadd.f32 %v2026_v32, %v3180_v8  ;;  %v1642_v35 = vpop.f32.mrb[51].mxu0  ;;  %v2028_v36 = vpop.f32.mrb[51].mxu1 }
 0x21f   :  { %2545 = vst [vmem:[#allocation8 + $0x308] sm:$0xff] %v2158_v29  ;;  %2547 = vst [vmem:[#allocation8 + $0x318] sm:$0xff] %v2160_v30  ;;  %v2162_v37 = vadd.f32 %v1642_v35, %v3182_v9  ;;  %v2164_v38 = vadd.f32 %v2028_v36, %v3184_v10 }
 0x220   :  { %2548 = vst [vmem:[#allocation8 + $0x320] sm:$0xff] %v2161_v33  ;;  %2550 = vst [vmem:[#allocation8 + $0x330] sm:$0xff] %v2163_v34 }
 0x221   :  { %2549 = vst [vmem:[#allocation8 + $0x328] sm:$0xff] %v2162_v37  ;;  %2551 = vst [vmem:[#allocation8 + $0x338] sm:$0xff] %v2164_v38 }
 0x223   :  { %v1646_v39 = vpop.f32.mrb[52].mxu0  ;;  %v2032_v40 = vpop.f32.mrb[52].mxu1 }
 0x224   :  { %v2165_v41 = vadd.f32 %v1646_v39, %v3178_v7  ;;  %v2167_v42 = vadd.f32 %v2032_v40, %v3180_v8  ;;  %v1648_v43 = vpop.f32.mrb[53].mxu0  ;;  %v2034_v44 = vpop.f32.mrb[53].mxu1 }
 0x225   :  { %v2166_v45 = vadd.f32 %v1648_v43, %v3182_v9  ;;  %v2168_v46 = vadd.f32 %v2034_v44, %v3184_v10  ;;  %v1650_v47 = vpop.f32.mrb[54].mxu0  ;;  %v2036_v48 = vpop.f32.mrb[54].mxu1 }
 0x226   :  { %2552 = vst [vmem:[#allocation8 + $0x340] sm:$0xff] %v2165_v41  ;;  %2554 = vst [vmem:[#allocation8 + $0x350] sm:$0xff] %v2167_v42  ;;  %v2169_v49 = vadd.f32 %v1650_v47, %v3178_v7  ;;  %v2171_v50 = vadd.f32 %v2036_v48, %v3180_v8  ;;  %v1652_v51 = vpop.f32.mrb[55].mxu0  ;;  %v2038_v52 = vpop.f32.mrb[55].mxu1 }
 0x227   :  { %2553 = vst [vmem:[#allocation8 + $0x348] sm:$0xff] %v2166_v45  ;;  %2555 = vst [vmem:[#allocation8 + $0x358] sm:$0xff] %v2168_v46  ;;  %v2170_v53 = vadd.f32 %v1652_v51, %v3182_v9  ;;  %v2172_v54 = vadd.f32 %v2038_v52, %v3184_v10 }
 0x228   :  { %2556 = vst [vmem:[#allocation8 + $0x360] sm:$0xff] %v2169_v49  ;;  %2558 = vst [vmem:[#allocation8 + $0x370] sm:$0xff] %v2171_v50 }
 0x229   :  { %2557 = vst [vmem:[#allocation8 + $0x368] sm:$0xff] %v2170_v53  ;;  %2559 = vst [vmem:[#allocation8 + $0x378] sm:$0xff] %v2172_v54 }
 0x22b   :  { %v1656_v55 = vpop.f32.mrb[56].mxu0  ;;  %v2042_v56 = vpop.f32.mrb[56].mxu1 }
 0x22c   :  { %v2173_v57 = vadd.f32 %v1656_v55, %v3178_v7  ;;  %v2175_v58 = vadd.f32 %v2042_v56, %v3180_v8  ;;  %v1658_v59 = vpop.f32.mrb[57].mxu0  ;;  %v2044_v60 = vpop.f32.mrb[57].mxu1 }
 0x22d   :  { %v2174_v61 = vadd.f32 %v1658_v59, %v3182_v9  ;;  %v2176_v62 = vadd.f32 %v2044_v60, %v3184_v10  ;;  %v1660_v63 = vpop.f32.mrb[58].mxu0  ;;  %v2046_v0 = vpop.f32.mrb[58].mxu1 }
 0x22e   :  { %2560 = vst [vmem:[#allocation8 + $0x380] sm:$0xff] %v2173_v57  ;;  %2562 = vst [vmem:[#allocation8 + $0x390] sm:$0xff] %v2175_v58  ;;  %v2177_v1 = vadd.f32 %v1660_v63, %v3178_v7  ;;  %v2179_v2 = vadd.f32 %v2046_v0, %v3180_v8  ;;  %v1662_v3 = vpop.f32.mrb[59].mxu0  ;;  %v2048_v4 = vpop.f32.mrb[59].mxu1 }
 0x22f   :  { %2561 = vst [vmem:[#allocation8 + $0x388] sm:$0xff] %v2174_v61  ;;  %2563 = vst [vmem:[#allocation8 + $0x398] sm:$0xff] %v2176_v62  ;;  %v2178_v5 = vadd.f32 %v1662_v3, %v3182_v9  ;;  %v2180_v6 = vadd.f32 %v2048_v4, %v3184_v10 }
 0x230   :  { %2564 = vst [vmem:[#allocation8 + $0x3a0] sm:$0xff] %v2177_v1  ;;  %2566 = vst [vmem:[#allocation8 + $0x3b0] sm:$0xff] %v2179_v2 }
 0x231   :  { %2565 = vst [vmem:[#allocation8 + $0x3a8] sm:$0xff] %v2178_v5  ;;  %2567 = vst [vmem:[#allocation8 + $0x3b8] sm:$0xff] %v2180_v6 }
 0x233   :  { %v1666_v11 = vpop.f32.mrb[60].mxu0  ;;  %v2052_v12 = vpop.f32.mrb[60].mxu1 }
 0x234   :  { %v2181_v13 = vadd.f32 %v1666_v11, %v3178_v7  ;;  %v2183_v14 = vadd.f32 %v2052_v12, %v3180_v8  ;;  %v1668_v15 = vpop.f32.mrb[61].mxu0  ;;  %v2054_v16 = vpop.f32.mrb[61].mxu1 }
 0x235   :  { %v2182_v17 = vadd.f32 %v1668_v15, %v3182_v9  ;;  %v2184_v18 = vadd.f32 %v2054_v16, %v3184_v10  ;;  %v1670_v19 = vpop.f32.mrb[62].mxu0  ;;  %v2056_v20 = vpop.f32.mrb[62].mxu1 }
 0x236   :  { %2568 = vst [vmem:[#allocation8 + $0x3c0] sm:$0xff] %v2181_v13  ;;  %2570 = vst [vmem:[#allocation8 + $0x3d0] sm:$0xff] %v2183_v14  ;;  %v2185_v21 = vadd.f32 %v1670_v19, %v3178_v7  ;;  %v2187_v22 = vadd.f32 %v2056_v20, %v3180_v8  ;;  %v1672_v23 = vpop.f32.mrb[63].mxu0  ;;  %v2058_v24 = vpop.f32.mrb[63].mxu1 }
 0x237   :  { %2569 = vst [vmem:[#allocation8 + $0x3c8] sm:$0xff] %v2182_v17  ;;  %2571 = vst [vmem:[#allocation8 + $0x3d8] sm:$0xff] %v2184_v18  ;;  %v2186_v25 = vadd.f32 %v1672_v23, %v3182_v9  ;;  %v2188_v26 = vadd.f32 %v2058_v24, %v3184_v10 }
 0x238   :  { %2572 = vst [vmem:[#allocation8 + $0x3e0] sm:$0xff] %v2185_v21  ;;  %2574 = vst [vmem:[#allocation8 + $0x3f0] sm:$0xff] %v2187_v22 }
 0x239   :  { %2573 = vst [vmem:[#allocation8 + $0x3e8] sm:$0xff] %v2186_v25  ;;  %2575 = vst [vmem:[#allocation8 + $0x3f8] sm:$0xff] %v2188_v26 }
 0x23a   :  { %3104 = shalt.err (!%p3101_p6)
}
 0x23b   :  { %s3105_s17 = scalar_lea.hbm %s3332_s3, 16384 }
 0x23c   :  { %p3106_p7 = scmp.ne.s32.totalorder %s3332_s3, %s3105_s17  ;;  %p3109_p8 = scmp.lt.u32.totalorder %s3105_s17, %s3332_s3 }
 0x23e   :  { %p3111_p9 = pnand %p3109_p8, %p3106_p7 }
 0x240   :  { %3114 = shalt.err (!%p3111_p9)
}
 0x241   :  { %2587 = dma.vmem_to_hbm [thread:$0]  %s2582_s13, 16384, %s3332_s3, [#allocation5], %s3122_s22, %s3122_s22, %s3123_s23  }
 0x242   :  { %3119 = dma.done.wait [#allocation5], 16384  }
 0x243   :  { %3120 = vsyncadd [#allocation5], 4294950912 }
 0x244   :  { %2591 = vsyncpa [#allocation4], 1 }
 0x245   :  { %2592 = vsyncpa [#allocation7], 1 }
 0x246   :  { %2593 = vsyncpa [#allocation5], 1 }

</bundles_post_ra>
